<compile_context>
chip_gen: v6e
topology: v6e:2x2x1
jax: 0.10.0
libtpu: 0.0.40
codegen_flags: <defaults>
</compile_context>

<pallas_src>
import functools

import jax
import jax.numpy as jnp
import numpy as np
from jax import lax
from jax.experimental import pallas as pl
from jax.experimental.pallas import tpu as pltpu


# ---------------------------------------------------------------------------
# helpers
# ---------------------------------------------------------------------------
def _fold_lane_groups(a, group, n_groups):
    """Sum lane-groups of stride `group` along the last axis.

    For a[..., m] with m = n*group + l, returns an array whose lanes
    [0, group) hold sum_n a[..., n*group + l] (every lane actually holds its
    full coset sum thanks to the rotation wrap-around).  Uses XLU lane
    rotations only -> no lane->sublane relayout.
    """
    if n_groups <= 1:
        return a
    axis = a.ndim - 1
    if n_groups & (n_groups - 1) == 0:          # power of two -> log2 tree
        shift = (group * n_groups) // 2
        while shift >= group:
            a = a + pltpu.roll(a, shift, axis)
            shift //= 2
        return a
    acc = a                                      # generic fallback
    for j in range(1, n_groups):
        acc = acc + pltpu.roll(a, j * group, axis)
    return acc


def _pick_num_blocks(n_batch, n_lat):
    """Grid split over the lane axis (=> over n).

    Only worth it when each block is big enough to amortize ~0.35us/step grid
    overhead and stays lane-dense; at the test size this returns 1, which is
    also the right answer on single-TensorCore v5e/v6e at any small size.
    """
    m = n_batch * n_lat
    if n_batch % 2 == 0 and (m // 2) % 128 == 0 and m >= 128 * 128:
        return 2
    return 1


@jax.custom_vjp
def _straight_through(x, q):
    # forward value == quantized; gradient flows to x only (STE), replacing
    # the module's `input + (quantized - input).data` elementwise pass.
    return q


def _st_fwd(x, q):
    return q, None


def _st_bwd(_, g):
    return (g, jnp.zeros_like(g))


_straight_through.defvjp(_st_fwd, _st_bwd)


# ---------------------------------------------------------------------------
# Pallas kernel: lane-dense nearest-code search + one-hot + quantize + fused
# per-block reductions (counts, dw, sum of squared commitment error).
# ---------------------------------------------------------------------------
def _vq_kernel(x_ref, e_ref, q_ref, enc_ref, counts_ref, dw_ref, sqerr_ref):
    d_dim, m_dim = x_ref.shape            # (D, Nb*L)   lane-dense activations
    k_dim = e_ref.shape[1]                # (D, K, Nb*L) codebook tiled over n
    l_dim = counts_ref.shape[2]           # L
    n_blk = m_dim // l_dim                # batch entries in this block

    x = x_ref[...]                        # (D, M)
    e = e_ref[...]                        # (D, K, M)

    # exact squared distances; reduction over D is the leading axis -> plain
    # VALU adds across slabs, no XLU work.
    diff = x[:, None, :] - e                               # (D, K, M)
    scores = jnp.sum(diff * diff, axis=0)                  # (K, M)

    # first-minimum argmin -> one-hot (matches torch.argmin tie-breaking).
    # NOTE: assumes finite inputs.
    min_s = jnp.min(scores, axis=0, keepdims=True)         # (1, M)
    k_iota = lax.broadcasted_iota(jnp.int32, (k_dim, m_dim), 0)
    idx = jnp.min(jnp.where(scores <= min_s, k_iota, k_dim),
                  axis=0, keepdims=True)                   # (1, M)
    enc = (k_iota == idx).astype(jnp.float32)              # (K, M)
    enc_ref[...] = enc                                     # full-width store

    # quantize via one-hot gather; one whole-block store.
    q = jnp.sum(enc[None, :, :] * e, axis=1)               # (D, M)
    q_ref[...] = q

    # commitment-loss partial sum -> scalar straight to SMEM.
    err = q - x
    sqerr_ref[0, 0] = jnp.sum(err * err)

    # fused per-block reductions over the batch part of the lane axis.
    counts_full = _fold_lane_groups(enc, l_dim, n_blk)                 # (K, M)
    counts_ref[0, :, :] = counts_full[:, :l_dim]                       # (K, L)
    dw_full = _fold_lane_groups(x[:, None, :] * enc[None, :, :],
                                l_dim, n_blk)                          # (D, K, M)
    dw_ref[0, :, :, :] = dw_full[:, :, :l_dim]                         # (D, K, L)


def _vq_pallas(x_lane, emb_tiled, n_lat, n_split):
    """x_lane: (D, M) with M = N*L (l minor), emb_tiled: (D, K, M).

    Returns (quantized (D, M), one-hot (K, M), counts (G, K, L),
             dw (G, D, K, L), sqerr (G, 1)) with G = n_split.
    """
    D, M = x_lane.shape
    K = emb_tiled.shape[1]
    L = n_lat
    G = n_split
    Mb = M // G
    return pl.pallas_call(
        _vq_kernel,
        out_shape=(
            jax.ShapeDtypeStruct((D, M), jnp.float32),        # quantized (lane-dense)
            jax.ShapeDtypeStruct((K, M), jnp.float32),        # one-hot   (lane-dense)
            jax.ShapeDtypeStruct((G, K, L), jnp.float32),     # per-block counts
            jax.ShapeDtypeStruct((G, D, K, L), jnp.float32),  # per-block dw
            jax.ShapeDtypeStruct((G, 1), jnp.float32),        # per-block sq err (SMEM)
        ),
        grid=(G,),
        in_specs=[
            pl.BlockSpec((D, Mb), lambda g: (0, g)),
            pl.BlockSpec((D, K, Mb), lambda g: (0, 0, g)),
        ],
        out_specs=(
            pl.BlockSpec((D, Mb), lambda g: (0, g)),
            pl.BlockSpec((K, Mb), lambda g: (0, g)),
            pl.BlockSpec((1, K, L), lambda g: (g, 0, 0)),
            pl.BlockSpec((1, D, K, L), lambda g: (g, 0, 0, 0)),
            pl.BlockSpec((1, 1), lambda g: (g, 0), memory_space=pltpu.SMEM),
        ),
        compiler_params=pltpu.CompilerParams(
            dimension_semantics=("parallel",)),
    )(x_lane, emb_tiled)


# ---------------------------------------------------------------------------
# Forward wrapper (free reshapes / tiny transposes, EMA updates, loss, perplexity)
# ---------------------------------------------------------------------------
@functools.partial(jax.jit, static_argnames=("decay", "epsilon", "training"))
def vq_ema_forward(x, embedding, dw_buf, cluster_size,
                   *, decay=0.99, epsilon=1e-6, training=True):
    """Functional equivalent of VQ_EMA.forward with independent_codebook=True.

    x:            (B0, B1, D, H, W)
    embedding:    (D, K, L)   with L == H*W (one codebook per latent)
    dw_buf:       (D, K, L)   EMA buffer
    cluster_size: (K, L)      EMA buffer
    """
    B0, B1, D, H, W = x.shape
    N, L = B0 * B1, H * W
    M = N * L
    K = embedding.shape[1]

    x_flat = x.reshape(N, D, L).astype(jnp.float32)              # module's .view
    # lane-dense relayout: merge (n, l) into the lane axis (tiny transpose)
    x_lane = jnp.transpose(x_flat, (1, 0, 2)).reshape(D, M)      # (D, M)
    emb_f32 = embedding.astype(jnp.float32)
    emb_tiled = jnp.broadcast_to(emb_f32[:, :, None, :],
                                 (D, K, N, L)).reshape(D, K, M)  # (D, K, M)

    G = _pick_num_blocks(N, L)
    q_lane, enc_lane, counts_p, dw_p, sqerr_p = _vq_pallas(x_lane, emb_tiled, L, G)

    quantized = jnp.transpose(q_lane.reshape(D, N, L), (1, 0, 2))    # (N, D, L)
    encoding = jnp.transpose(enc_lane.reshape(K, N, L), (1, 0, 2))   # (N, K, L)
    counts = jnp.sum(counts_p, axis=0)                               # (K, L)
    dw_batch = jnp.sum(dw_p, axis=0)                                 # (D, K, L)
    sq_err = jnp.sum(sqerr_p)                                        # scalar

    encoding_out = encoding.reshape(B0, B1, K, H, W)
    if training:
        # Laplace-smooth the *old* cluster sizes, then EMA with the new counts.
        n_tot = jnp.sum(cluster_size, axis=-1, keepdims=True) + 1e-6        # (K, 1)
        cs = (cluster_size + epsilon) / (n_tot + K * epsilon) * n_tot       # (K, L)
        new_cluster_size = decay * cs + (1.0 - decay) * counts

        avg_probs = counts / N                                              # (K, L)
        perplexity = jnp.exp(
            -jnp.sum(avg_probs * jnp.log(avg_probs + 1e-10), axis=0)) / K   # (L,)

        new_dw = decay * dw_buf + (1.0 - decay) * (
            dw_batch / new_cluster_size[None, :, :])                        # (D, K, L)
        new_embedding = decay * emb_f32 + (1.0 - decay) * new_dw            # (D, K, L)

        commitment_loss = sq_err / (N * D * L)
        quantized_st = _straight_through(x_flat, quantized)                 # STE
        quantized_out = quantized_st.reshape(B0, B1, D, H, W)
        return (quantized_out, encoding_out, commitment_loss, perplexity,
                new_embedding, new_dw, new_cluster_size)
    quantized_out = quantized.reshape(B0, B1, D, H, W)
    return (quantized_out, encoding_out, None, None,
            embedding, dw_buf, cluster_size)


# ---------------------------------------------------------------------------
# Pure-JAX reference (mirrors the PyTorch code literally) for validation
# ---------------------------------------------------------------------------
def _ref_forward(x, embedding, dw_buf, cluster_size, decay=0.99, epsilon=1e-6):
    B0, B1, D, H, W = x.shape
    N, L = B0 * B1, H * W
    K = embedding.shape[1]
    xin = x.reshape(N, D, L)

    dists = jnp.linalg.norm(embedding[None] - xin[:, :, None, :], axis=1)   # (N, K, L)
    idx = jnp.argmin(dists, axis=1)                                         # (N, L)
    enc = jax.nn.one_hot(idx, K, axis=1, dtype=jnp.float32)                 # (N, K, L)

    flat_e = jnp.transpose(embedding, (2, 1, 0)).reshape(-1, D)             # (L*K, D)
    offs = jnp.arange(L) * K
    quantized = jnp.transpose(
        flat_e[(idx + offs[None, :]).reshape(-1)].reshape(N, L, D),
        (0, 2, 1))                                                          # (N, D, L)

    n_tot = jnp.sum(cluster_size, axis=-1, keepdims=True) + 1e-6
    cs = (cluster_size + epsilon) / (n_tot + K * epsilon) * n_tot
    cs = decay * cs + (1.0 - decay) * jnp.sum(enc, axis=0)
    dw_b = jnp.sum(enc[:, None, :, :] * xin[:, :, None, :], axis=0)         # (D, K, L)
    avg_probs = jnp.mean(enc, axis=0)
    perplexity = jnp.exp(-jnp.sum(avg_probs * jnp.log(avg_probs + 1e-10), axis=0)) / K
    new_dw = decay * dw_buf + (1.0 - decay) * (dw_b / cs[None])
    new_emb = decay * embedding + (1.0 - decay) * new_dw
    loss = jnp.mean((quantized - xin) ** 2)
    return (quantized.reshape(B0, B1, D, H, W),
            enc.reshape(B0, B1, K, H, W), loss, perplexity,
            new_emb, new_dw, cs)


if __name__ == "__main__":
    # small shapes consistent with the module:
    #   embedding_dim D=16, num_embeddings K=32, num_latents L=H*W=16
    B0, B1, D, H, W = 2, 4, 16, 4, 4
    K = 32
    L = H * W

    key = jax.random.PRNGKey(0)
    k_x, k_e = jax.random.split(key)
    x = jax.random.normal(k_x, (B0, B1, D, H, W), jnp.float32)

    # deterministic parameter init, matching __init__:
    #   embedding = 0.01 * randn(D, K) replicated across latents
    emb2d = 0.01 * jax.random.normal(k_e, (D, K), jnp.float32)
    embedding = jnp.stack([emb2d] * L, axis=-1)                 # (D, K, L)
    dw_buf = jnp.zeros((D, K, L), jnp.float32)
    cluster_size = jnp.zeros((K, L), jnp.float32)

    out = vq_ema_forward(x, embedding, dw_buf, cluster_size,
                         decay=0.99, epsilon=1e-6, training=True)
    out = jax.block_until_ready(out)
    quantized, encoding, loss, perplexity, new_emb, new_dw, new_cs = out

    # validate against a literal pure-JAX port of the torch forward
    ref = _ref_forward(x, embedding, dw_buf, cluster_size)
    np.testing.assert_allclose(np.asarray(quantized), np.asarray(ref[0]),
                               rtol=1e-5, atol=1e-5)
    np.testing.assert_allclose(np.asarray(encoding), np.asarray(ref[1]),
                               rtol=0, atol=0)
    np.testing.assert_allclose(float(loss), float(ref[2]), rtol=1e-5, atol=1e-5)
    np.testing.assert_allclose(np.asarray(perplexity), np.asarray(ref[3]),
                               rtol=1e-5, atol=1e-6)
    np.testing.assert_allclose(np.asarray(new_emb), np.asarray(ref[4]),
                               rtol=1e-4, atol=1e-5)

    print("KERNEL_OK")
</pallas_src>

<mosaic_0001>
module attributes {stable_mosaic.version = 11 : i64} {
  func.func @_vq_kernel(%arg0: i32, %arg1: memref<16x128xf32, #tpu.memory_space<vmem>>, %arg2: memref<16x32x128xf32, #tpu.memory_space<vmem>>, %arg3: memref<16x128xf32, #tpu.memory_space<vmem>>, %arg4: memref<32x128xf32, #tpu.memory_space<vmem>>, %arg5: memref<1x32x16xf32, #tpu.memory_space<vmem>>, %arg6: memref<1x16x32x16xf32, #tpu.memory_space<vmem>>, %arg7: memref<1x1xf32, #tpu.memory_space<smem>>) attributes {dimension_semantics = [#tpu.dimension_semantics<parallel>], iteration_bounds = array<i64: 1>, scalar_prefetch = 0 : i64, scratch_operands = 0 : i64, tpu.core_type = #tpu.core_type<tc>, window_params = [{transform_indices = @transform_0, window_bounds = array<i64: 16, 128>}, {transform_indices = @transform_1, window_bounds = array<i64: 16, 32, 128>}, {transform_indices = @transform_2, window_bounds = array<i64: 16, 128>}, {transform_indices = @transform_3, window_bounds = array<i64: 32, 128>}, {transform_indices = @transform_4, window_bounds = array<i64: 1, 32, 16>}, {transform_indices = @transform_5, window_bounds = array<i64: 1, 16, 32, 16>}, {transform_indices = @transform_6, window_bounds = array<i64: 1, 1>}]} {
    %c0 = arith.constant 0 : index
    %c0_0 = arith.constant 0 : index
    %0 = vector.load %arg1[%c0, %c0_0] : memref<16x128xf32, #tpu.memory_space<vmem>>, vector<16x128xf32>
    %c0_1 = arith.constant 0 : index
    %c0_2 = arith.constant 0 : index
    %c0_3 = arith.constant 0 : index
    %1 = vector.load %arg2[%c0_1, %c0_2, %c0_3] : memref<16x32x128xf32, #tpu.memory_space<vmem>>, vector<16x32x128xf32>
    %2 = vector.shape_cast %0 : vector<16x128xf32> to vector<16x1x128xf32>
    %3 = vector.broadcast %2 : vector<16x1x128xf32> to vector<16x32x128xf32>
    %4 = arith.subf %3, %1 : vector<16x32x128xf32>
    %5 = arith.mulf %4, %4 : vector<16x32x128xf32>
    %cst = arith.constant dense<0.000000e+00> : vector<32x128xf32>
    %6 = vector.multi_reduction <add>, %5, %cst [0] : vector<16x32x128xf32> to vector<32x128xf32>
    %cst_4 = arith.constant dense<0x7F800000> : vector<128xf32>
    %7 = vector.multi_reduction <minimumf>, %6, %cst_4 [0] : vector<32x128xf32> to vector<128xf32>
    %8 = vector.shape_cast %7 : vector<128xf32> to vector<1x128xf32>
    %9 = tpu.iota {dimensions = array<i32: 0>} : vector<32x128xi32>
    %10 = vector.broadcast %8 : vector<1x128xf32> to vector<32x128xf32>
    %11 = arith.cmpf ole, %6, %10 : vector<32x128xf32>
    %c32_i32 = arith.constant 32 : i32
    %12 = vector.broadcast %c32_i32 : i32 to vector<32x128xi32>
    %13 = arith.select %11, %9, %12 : vector<32x128xi1>, vector<32x128xi32>
    %cst_5 = arith.constant dense<2147483647> : vector<128xi32>
    %14 = vector.multi_reduction <minsi>, %13, %cst_5 [0] : vector<32x128xi32> to vector<128xi32>
    %15 = vector.shape_cast %14 : vector<128xi32> to vector<1x128xi32>
    %16 = vector.broadcast %15 : vector<1x128xi32> to vector<32x128xi32>
    %17 = arith.cmpi eq, %9, %16 : vector<32x128xi32>
    %18 = arith.extui %17 : vector<32x128xi1> to vector<32x128xi32>
    %19 = arith.sitofp %18 : vector<32x128xi32> to vector<32x128xf32>
    %c0_6 = arith.constant 0 : index
    %c0_7 = arith.constant 0 : index
    %20 = vector.load %arg4[%c0_6, %c0_7] : memref<32x128xf32, #tpu.memory_space<vmem>>, vector<32x128xf32>
    tpu.vector_store %arg4[%c0_6, %c0_7], %19 {strides = array<i32>} : memref<32x128xf32, #tpu.memory_space<vmem>>, vector<32x128xf32>,
    %21 = vector.shape_cast %19 : vector<32x128xf32> to vector<1x32x128xf32>
    %22 = vector.broadcast %21 : vector<1x32x128xf32> to vector<16x32x128xf32>
    %23 = arith.mulf %22, %1 : vector<16x32x128xf32>
    %cst_8 = arith.constant dense<0.000000e+00> : vector<16x128xf32>
    %24 = vector.multi_reduction <add>, %23, %cst_8 [1] : vector<16x32x128xf32> to vector<16x128xf32>
    %c0_9 = arith.constant 0 : index
    %c0_10 = arith.constant 0 : index
    %25 = vector.load %arg3[%c0_9, %c0_10] : memref<16x128xf32, #tpu.memory_space<vmem>>, vector<16x128xf32>
    tpu.vector_store %arg3[%c0_9, %c0_10], %24 {strides = array<i32>} : memref<16x128xf32, #tpu.memory_space<vmem>>, vector<16x128xf32>,
    %26 = arith.subf %24, %0 : vector<16x128xf32>
    %27 = arith.mulf %26, %26 : vector<16x128xf32>
    %28 = vector.shape_cast %27 : vector<16x128xf32> to vector<1x16x128xf32>
    %cst_11 = arith.constant dense<0.000000e+00> : vector<1xf32>
    %29 = vector.multi_reduction <add>, %28, %cst_11 [1, 2] : vector<1x16x128xf32> to vector<1xf32>
    %30 = vector.shape_cast %29 : vector<1xf32> to vector<1x1x1xf32>
    %31 = vector.extract %30[0, 0, 0] : f32 from vector<1x1x1xf32>
    %c0_12 = arith.constant 0 : index
    %c0_13 = arith.constant 0 : index
    %32 = memref.load %arg7[%c0_12, %c0_13] : memref<1x1xf32, #tpu.memory_space<smem>>
    memref.store %31, %arg7[%c0_12, %c0_13] : memref<1x1xf32, #tpu.memory_space<smem>>
    %c64_i32 = arith.constant 64 : i32
    %33 = tpu.dynamic_rotate %19 by %c64_i32 dim 1 : vector<32x128xf32>, i32 -> vector<32x128xf32>
    %34 = arith.addf %19, %33 : vector<32x128xf32>
    %c32_i32_14 = arith.constant 32 : i32
    %35 = tpu.dynamic_rotate %34 by %c32_i32_14 dim 1 : vector<32x128xf32>, i32 -> vector<32x128xf32>
    %36 = arith.addf %34, %35 : vector<32x128xf32>
    %c16_i32 = arith.constant 16 : i32
    %37 = tpu.dynamic_rotate %36 by %c16_i32 dim 1 : vector<32x128xf32>, i32 -> vector<32x128xf32>
    %38 = arith.addf %36, %37 : vector<32x128xf32>
    %39 = vector.extract_strided_slice %38 {offsets = [0, 0], sizes = [32, 16], strides = [1, 1]} : vector<32x128xf32> to vector<32x16xf32>
    %c0_15 = arith.constant 0 : index
    %c0_16 = arith.constant 0 : index
    %c0_17 = arith.constant 0 : index
    %40 = vector.load %arg5[%c0_15, %c0_16, %c0_17] : memref<1x32x16xf32, #tpu.memory_space<vmem>>, vector<1x32x16xf32>
    %41 = vector.shape_cast %40 : vector<1x32x16xf32> to vector<32x16xf32>
    %42 = vector.shape_cast %39 : vector<32x16xf32> to vector<1x32x16xf32>
    tpu.vector_store %arg5[%c0_15, %c0_16, %c0_17], %42 {strides = array<i32>} : memref<1x32x16xf32, #tpu.memory_space<vmem>>, vector<1x32x16xf32>,
    %43 = vector.shape_cast %0 : vector<16x128xf32> to vector<16x1x128xf32>
    %44 = vector.shape_cast %19 : vector<32x128xf32> to vector<1x32x128xf32>
    %45 = vector.broadcast %43 : vector<16x1x128xf32> to vector<16x32x128xf32>
    %46 = vector.broadcast %44 : vector<1x32x128xf32> to vector<16x32x128xf32>
    %47 = arith.mulf %45, %46 : vector<16x32x128xf32>
    %c64_i32_18 = arith.constant 64 : i32
    %48 = tpu.dynamic_rotate %47 by %c64_i32_18 dim 2 : vector<16x32x128xf32>, i32 -> vector<16x32x128xf32>
    %49 = arith.addf %47, %48 : vector<16x32x128xf32>
    %c32_i32_19 = arith.constant 32 : i32
    %50 = tpu.dynamic_rotate %49 by %c32_i32_19 dim 2 : vector<16x32x128xf32>, i32 -> vector<16x32x128xf32>
    %51 = arith.addf %49, %50 : vector<16x32x128xf32>
    %c16_i32_20 = arith.constant 16 : i32
    %52 = tpu.dynamic_rotate %51 by %c16_i32_20 dim 2 : vector<16x32x128xf32>, i32 -> vector<16x32x128xf32>
    %53 = arith.addf %51, %52 : vector<16x32x128xf32>
    %54 = vector.extract_strided_slice %53 {offsets = [0, 0, 0], sizes = [16, 32, 16], strides = [1, 1, 1]} : vector<16x32x128xf32> to vector<16x32x16xf32>
    %c0_21 = arith.constant 0 : index
    %c0_22 = arith.constant 0 : index
    %c0_23 = arith.constant 0 : index
    %c0_24 = arith.constant 0 : index
    %55 = vector.load %arg6[%c0_21, %c0_22, %c0_23, %c0_24] : memref<1x16x32x16xf32, #tpu.memory_space<vmem>>, vector<1x16x32x16xf32>
    %56 = vector.shape_cast %55 : vector<1x16x32x16xf32> to vector<16x32x16xf32>
    %57 = vector.shape_cast %54 : vector<16x32x16xf32> to vector<1x16x32x16xf32>
    tpu.vector_store %arg6[%c0_21, %c0_22, %c0_23, %c0_24], %57 {strides = array<i32>} : memref<1x16x32x16xf32, #tpu.memory_space<vmem>>, vector<1x16x32x16xf32>,
    return
  }
  func.func @transform_0(%arg0: i32) -> (i32, i32) {
    %c0_i32 = arith.constant 0 : i32
    %c0_i32_0 = arith.constant 0 : i32
    return %c0_i32, %arg0 : i32, i32
  }
  func.func @transform_1(%arg0: i32) -> (i32, i32, i32) {
    %c0_i32 = arith.constant 0 : i32
    %c0_i32_0 = arith.constant 0 : i32
    %c0_i32_1 = arith.constant 0 : i32
    return %c0_i32, %c0_i32_0, %arg0 : i32, i32, i32
  }
  func.func @transform_2(%arg0: i32) -> (i32, i32) {
    %c0_i32 = arith.constant 0 : i32
    %c0_i32_0 = arith.constant 0 : i32
    return %c0_i32, %arg0 : i32, i32
  }
  func.func @transform_3(%arg0: i32) -> (i32, i32) {
    %c0_i32 = arith.constant 0 : i32
    %c0_i32_0 = arith.constant 0 : i32
    return %c0_i32, %arg0 : i32, i32
  }
  func.func @transform_4(%arg0: i32) -> (i32, i32, i32) {
    %c0_i32 = arith.constant 0 : i32
    %c0_i32_0 = arith.constant 0 : i32
    %c0_i32_1 = arith.constant 0 : i32
    return %arg0, %c0_i32, %c0_i32_0 : i32, i32, i32
  }
  func.func @transform_5(%arg0: i32) -> (i32, i32, i32, i32) {
    %c0_i32 = arith.constant 0 : i32
    %c0_i32_0 = arith.constant 0 : i32
    %c0_i32_1 = arith.constant 0 : i32
    %c0_i32_2 = arith.constant 0 : i32
    return %arg0, %c0_i32, %c0_i32_0, %c0_i32_1 : i32, i32, i32, i32
  }
  func.func @transform_6(%arg0: i32) -> (i32, i32) {
    %c0_i32 = arith.constant 0 : i32
    %c0_i32_0 = arith.constant 0 : i32
    return %arg0, %c0_i32 : i32, i32
  }
}

</mosaic_0001>

<bundles_post_ra>
// kernel: vq_ema_forward.1
= control target key start
LH: loop header
LB: loop body
LE: loop exit
PB: predicated region body
PF: predicated region fallthrough
CT: control target
= control target key end

     0   :  { %v1687_v0 = vmov 1966171168   ;;  %v89_v2 = vlaneseq  ;;  %s4248_s0 = inlined_call_operand.vmem [shape: f32[16,128], index: 0, kind: input, shape index: {}]   ;;  %s4249_s1 = inlined_call_operand.vmem [shape: f32[16,32,128], index: 1, kind: input, shape index: {}]   ;;  %s4250_s2 = inlined_call_operand.vmem [shape: f32[16,128], index: 2, kind: output, shape index: {0}]   ;;  %s4251_s3 = inlined_call_operand.vmem [shape: f32[32,128], index: 3, kind: output, shape index: {1}]   ;;  %s4252_s4 = inlined_call_operand.vmem [shape: f32[1,32,16], index: 4, kind: output, shape index: {2}]   ;;  %s4253_s5 = inlined_call_operand.vmem [shape: f32[1,16,32,16], index: 5, kind: output, shape index: {3}]   ;;  %s4254_s6 = inlined_call_operand.hbm [shape: f32[1,1], index: 6, kind: output, shape index: {4}]  }
   0x1   :  { %v87_v1 = vunpack.c.l.s4 %v1687_v0  ;;  %v17_v5 = vld [vmem:[%s4248_s0] sm:$0xff]  ;;  %v18_v8 = vld [vmem:[%s4248_s0 + $0x8] sm:$0xff] }
   0x2   :  { %v1728_v4 = vshrl.u32 %v89_v2, 7  ;;  %v85_v6 = vcombine.high %v17_v5, %v17_v5  ;;  %v134_v9 = vcombine.high %v18_v8, %v18_v8 }
   0x3   :  { %v88_v3 = vunpack.c.0.s8 %v87_v1 }
   0x4   :  { %4427 = vst [vmem:[#allocation5_spill] sm:$0xff] %v1728_v4  ;;  %v185_v22 = vsub.s32 0, %v1728_v4 }
   0x5   :  { %v91_v7 = vsub.s32 %v88_v3, %v1728_v4 }
   0x7   :  { %v92_v10 = vrot.slane %v17_v5, %v91_v7  ;;  %v99_v11 = vrot.slane %v85_v6, %v91_v7  ;;  %v141_v12 = vrot.slane %v18_v8, %v91_v7  ;;  %v148_v13 = vrot.slane %v134_v9, %v91_v7 }
   0x9   :  { %v100_v14 = vcombine.high %v92_v10, %v92_v10  ;;  %v101_v15 = vcombine.high %v99_v11, %v99_v11  ;;  %v108_v16 = vrot.slane %v92_v10, %v91_v7  ;;  %v149_v17 = vcombine.high %v141_v12, %v141_v12 }
   0xa   :  { %v150_v18 = vcombine.high %v148_v13, %v148_v13  ;;  %v115_v19 = vrot.slane %v99_v11, %v91_v7  ;;  %v157_v24 = vrot.slane %v141_v12, %v91_v7  ;;  %v164_v25 = vrot.slane %v148_v13, %v91_v7 }
   0xb   :  { %v122_v20 = vrot.slane %v100_v14, %v91_v7  ;;  %v129_v21 = vrot.slane %v101_v15, %v91_v7  ;;  %v130_v23 = vcombine.high %v108_v16, %v108_v16  ;;  %v171_v26 = vrot.slane %v149_v17, %v91_v7 }
   0xc   :  { %12 = vsyncpa [#allocation3], 0  ;;  %v131_v27 = vcombine.high %v115_v19, %v115_v19  ;;  %v178_v30 = vrot.slane %v150_v18, %v91_v7  ;;  %v179_v31 = vcombine.high %v157_v24, %v157_v24  ;;  %v1741_v33 = vld [vmem:[%s4249_s1] sm:$0xff]  ;;  %v1746_v34 = vld [vmem:[%s4249_s1 + $0x8] sm:$0xff]  ;;  %v180_v37 = vcombine.high %v164_v25, %v164_v25  ;;  %s1689_s16 = smov 64   ;;  %s1691_s23 = smov 16  }
   0xd   :  { %v132_v28 = vcombine.high %v122_v20, %v122_v20  ;;  %v133_v29 = vcombine.high %v129_v21, %v129_v21  ;;  %v181_v32 = vcombine.high %v171_v26, %v171_v26  ;;  %4428 = vst [vmem:[#allocation6_spill] sm:$0xff] %v1741_v33  ;;  %4429 = vst [vmem:[#allocation7_spill] sm:$0xff] %v1746_v34  ;;  %v1751_v35 = vld [vmem:[%s4249_s1 + $0x10] sm:$0xff]  ;;  %v1756_v36 = vld [vmem:[%s4249_s1 + $0x18] sm:$0xff]  ;;  %vm728_vm14 = vcmask 1041409   ;;  %s1692_s21 = smov [#allocation2]  }
   0xe   :  { %4430 = vst [vmem:[#allocation8_spill] sm:$0xff] %v1751_v35  ;;  %4431 = vst [vmem:[#allocation9_spill] sm:$0xff] %v1756_v36  ;;  %v182_v38 = vcombine.high %v178_v30, %v178_v30  ;;  %v1761_v39 = vld [vmem:[%s4249_s1 + $0x20] sm:$0xff]  ;;  %v1766_v40 = vld [vmem:[%s4249_s1 + $0x28] sm:$0xff]  ;;  %v1778_v43 = vrot.slane %v108_v16, %v185_v22  ;;  %v1780_v44 = vrot.slane %v122_v20, %v185_v22  ;;  %vm730_vm15 = vcmask 1042434  }
   0xf   :  { %4432 = vst [vmem:[#allocation10_spill] sm:$0xff] %v1761_v39  ;;  %4433 = vst [vmem:[#allocation11_spill] sm:$0xff] %v1766_v40  ;;  %v1771_v41 = vld [vmem:[%s4249_s1 + $0x30] sm:$0xff]  ;;  %v1776_v42 = vld [vmem:[%s4249_s1 + $0x38] sm:$0xff]  ;;  %v1782_v45 = vrot.slane %v130_v23, %v185_v22  ;;  %v1784_v46 = vrot.slane %v115_v19, %v185_v22  ;;  %v1806_v51 = vrot.slane %v132_v28, %v185_v22 }
  0x10   :  { %4434 = vst [vmem:[#allocation12_spill] sm:$0xff] %v1771_v41  ;;  %4435 = vst [vmem:[#allocation13_spill] sm:$0xff] %v1776_v42  ;;  %v1789_v47 = vld [vmem:[%s4249_s1 + $0x40] sm:$0xff]  ;;  %v1794_v48 = vld [vmem:[%s4249_s1 + $0x48] sm:$0xff]  ;;  %v1808_v52 = vrot.slane %v129_v21, %v185_v22  ;;  %v1810_v53 = vrot.slane %v131_v27, %v185_v22  ;;  %v1812_v54 = vrot.slane %v133_v29, %v185_v22 }
  0x11   :  { %4436 = vst [vmem:[#allocation14_spill] sm:$0xff] %v1778_v43  ;;  %4437 = vst [vmem:[#allocation15_spill] sm:$0xff] %v1780_v44  ;;  %v1799_v49 = vld [vmem:[%s4249_s1 + $0x50] sm:$0xff]  ;;  %v1804_v50 = vld [vmem:[%s4249_s1 + $0x58] sm:$0xff]  ;;  %v1834_v59 = vrot.slane %v157_v24, %v185_v22  ;;  %v1836_v60 = vrot.slane %v171_v26, %v185_v22  ;;  %v1838_v61 = vrot.slane %v179_v31, %v185_v22 }
  0x12   :  { %4438 = vst [vmem:[#allocation16_spill] sm:$0xff] %v1782_v45  ;;  %4439 = vst [vmem:[#allocation17_spill] sm:$0xff] %v1784_v46  ;;  %v1817_v55 = vld [vmem:[%s4249_s1 + $0x60] sm:$0xff]  ;;  %v1822_v56 = vld [vmem:[%s4249_s1 + $0x68] sm:$0xff]  ;;  %v1840_v62 = vrot.slane %v181_v32, %v185_v22  ;;  %v1862_v3 = vrot.slane %v164_v25, %v185_v22  ;;  %v1864_v5 = vrot.slane %v178_v30, %v185_v22 }
  0x13   :  { %4440 = vst [vmem:[#allocation18_spill] sm:$0xff] %v1789_v47  ;;  %4441 = vst [vmem:[#allocation19_spill] sm:$0xff] %v1794_v48  ;;  %v1827_v57 = vld [vmem:[%s4249_s1 + $0x70] sm:$0xff]  ;;  %v1832_v58 = vld [vmem:[%s4249_s1 + $0x78] sm:$0xff]  ;;  %v1866_v6 = vrot.slane %v180_v37, %v185_v22  ;;  %v1868_v7 = vrot.slane %v182_v38, %v185_v22  ;;  %v1892_v12 = vsub.f32 %v1778_v43, %v1741_v33 }
  0x14   :  { %4442 = vst [vmem:[#allocation20_spill] sm:$0xff] %v1799_v49  ;;  %4443 = vst [vmem:[#allocation21_spill] sm:$0xff] %v1804_v50  ;;  %v1845_v63 = vld [vmem:[%s4249_s1 + $0x80] sm:$0xff]  ;;  %v1850_v0 = vld [vmem:[%s4249_s1 + $0x88] sm:$0xff]  ;;  %v1896_v13 = vsub.f32 %v1778_v43, %v1746_v34  ;;  %v1900_v14 = vsub.f32 %v1778_v43, %v1751_v35  ;;  %v1904_v15 = vsub.f32 %v1778_v43, %v1756_v36 }
  0x15   :  { %4444 = vst [vmem:[#allocation22_spill] sm:$0xff] %v1806_v51  ;;  %4445 = vst [vmem:[#allocation23_spill] sm:$0xff] %v1808_v52  ;;  %v1855_v1 = vld [vmem:[%s4249_s1 + $0x90] sm:$0xff]  ;;  %v1860_v2 = vld [vmem:[%s4249_s1 + $0x98] sm:$0xff]  ;;  %v1928_v20 = vsub.f32 %v1780_v44, %v1761_v39  ;;  %v1932_v21 = vsub.f32 %v1780_v44, %v1766_v40  ;;  %v1936_v22 = vsub.f32 %v1780_v44, %v1771_v41 }
  0x16   :  { %4446 = vst [vmem:[#allocation24_spill] sm:$0xff] %v1810_v53  ;;  %4447 = vst [vmem:[#allocation25_spill] sm:$0xff] %v1812_v54  ;;  %v1873_v8 = vld [vmem:[%s4249_s1 + $0xa0] sm:$0xff]  ;;  %v1878_v9 = vld [vmem:[%s4249_s1 + $0xa8] sm:$0xff]  ;;  %v1940_v23 = vsub.f32 %v1780_v44, %v1776_v42  ;;  %v1964_v28 = vsub.f32 %v1782_v45, %v1789_v47  ;;  %v1968_v29 = vsub.f32 %v1782_v45, %v1794_v48 }
  0x17   :  { %4448 = vst [vmem:[#allocation26_spill] sm:$0xff] %v1817_v55  ;;  %4449 = vst [vmem:[#allocation27_spill] sm:$0xff] %v1822_v56  ;;  %v1883_v10 = vld [vmem:[%s4249_s1 + $0xb0] sm:$0xff]  ;;  %v1888_v11 = vld [vmem:[%s4249_s1 + $0xb8] sm:$0xff]  ;;  %v1972_v30 = vsub.f32 %v1782_v45, %v1799_v49  ;;  %v1976_v31 = vsub.f32 %v1782_v45, %v1804_v50  ;;  %v2000_v49 = vsub.f32 %v1806_v51, %v1817_v55 }
  0x18   :  { %4450 = vst [vmem:[#allocation28_spill] sm:$0xff] %v1827_v57  ;;  %4451 = vst [vmem:[#allocation29_spill] sm:$0xff] %v1832_v58  ;;  %v1909_v16 = vld [vmem:[%s4249_s1 + $0xc0] sm:$0xff]  ;;  %v1914_v17 = vld [vmem:[%s4249_s1 + $0xc8] sm:$0xff]  ;;  %v2004_v48 = vsub.f32 %v1806_v51, %v1822_v56  ;;  %v2008_v47 = vsub.f32 %v1806_v51, %v1827_v57  ;;  %v2012_v42 = vsub.f32 %v1806_v51, %v1832_v58 }
  0x19   :  { %4452 = vst [vmem:[#allocation30_spill] sm:$0xff] %v1834_v59  ;;  %4453 = vst [vmem:[#allocation31_spill] sm:$0xff] %v1836_v60  ;;  %v1919_v18 = vld [vmem:[%s4249_s1 + $0xd0] sm:$0xff]  ;;  %v1924_v19 = vld [vmem:[%s4249_s1 + $0xd8] sm:$0xff]  ;;  %v2031_v57 = vsub.f32 %v1784_v46, %v1845_v63  ;;  %v2035_v58 = vsub.f32 %v1784_v46, %v1850_v0  ;;  %v2039_v40 = vsub.f32 %v1784_v46, %v1855_v1 }
  0x1a   :  { %4454 = vst [vmem:[#allocation32_spill] sm:$0xff] %v1838_v61  ;;  %4455 = vst [vmem:[#allocation33_spill] sm:$0xff] %v1840_v62  ;;  %v1945_v24 = vld [vmem:[%s4249_s1 + $0xe0] sm:$0xff]  ;;  %v1950_v25 = vld [vmem:[%s4249_s1 + $0xe8] sm:$0xff]  ;;  %v2043_v39 = vsub.f32 %v1784_v46, %v1860_v2  ;;  %v2070_v35 = vsub.f32 %v1808_v52, %v1883_v10  ;;  %v2074_v34 = vsub.f32 %v1808_v52, %v1888_v11 }
  0x1b   :  { %4456 = vst [vmem:[#allocation34_spill] sm:$0xff] %v1845_v63  ;;  %4457 = vst [vmem:[#allocation35_spill] sm:$0xff] %v1850_v0  ;;  %v1955_v26 = vld [vmem:[%s4249_s1 + $0xf0] sm:$0xff]  ;;  %v1960_v27 = vld [vmem:[%s4249_s1 + $0xf8] sm:$0xff]  ;;  %v2105_v46 = vsub.f32 %v1810_v53, %v1924_v19 }
  0x1c   :  { %4458 = vst [vmem:[#allocation36_spill] sm:$0xff] %v1855_v1  ;;  %4459 = vst [vmem:[#allocation37_spill] sm:$0xff] %v1860_v2  ;;  %v1981_v32 = vld [vmem:[%s4249_s1 + $0x100] sm:$0xff]  ;;  %v1986_v37 = vld [vmem:[%s4249_s1 + $0x108] sm:$0xff]  ;;  %v2062_v1 = vsub.f32 %v1808_v52, %v1873_v8  ;;  %v2066_v2 = vsub.f32 %v1808_v52, %v1878_v9  ;;  %v2101_v52 = vsub.f32 %v1810_v53, %v1919_v18 }
  0x1d   :  { %4460 = vst [vmem:[#allocation38_spill] sm:$0xff] %v1862_v3  ;;  %4461 = vst [vmem:[#allocation39_spill] sm:$0xff] %v1864_v5  ;;  %v1991_v38 = vld [vmem:[%s4249_s1 + $0x110] sm:$0xff]  ;;  %v1996_v50 = vld [vmem:[%s4249_s1 + $0x118] sm:$0xff]  ;;  %v2136_v45 = vsub.f32 %v1812_v54, %v1960_v27 }
  0x1e   :  { %4462 = vst [vmem:[#allocation40_spill] sm:$0xff] %v1866_v6  ;;  %4463 = vst [vmem:[#allocation41_spill] sm:$0xff] %v1868_v7  ;;  %v2017_v41 = vld [vmem:[%s4249_s1 + $0x120] sm:$0xff]  ;;  %v2022_v55 = vld [vmem:[%s4249_s1 + $0x128] sm:$0xff]  ;;  %v2167_v43 = vsub.f32 %v1834_v59, %v1996_v50 }
  0x1f   :  { %4464 = vst [vmem:[#allocation42_spill] sm:$0xff] %v1873_v8  ;;  %4465 = vst [vmem:[#allocation43_spill] sm:$0xff] %v1878_v9  ;;  %v2027_v56 = vld [vmem:[%s4249_s1 + $0x130] sm:$0xff]  ;;  %v2048_v36 = vld [vmem:[%s4249_s1 + $0x138] sm:$0xff] }
  0x20   :  { %4466 = vst [vmem:[#allocation44_spill] sm:$0xff] %v1883_v10  ;;  %4467 = vst [vmem:[#allocation45_spill] sm:$0xff] %v1888_v11  ;;  %v2053_v63 = vld [vmem:[%s4249_s1 + $0x140] sm:$0xff]  ;;  %v2058_v0 = vld [vmem:[%s4249_s1 + $0x148] sm:$0xff]  ;;  %v2093_v10 = vsub.f32 %v1810_v53, %v1909_v16  ;;  %v2097_v11 = vsub.f32 %v1810_v53, %v1914_v17  ;;  %v2132_v53 = vsub.f32 %v1812_v54, %v1955_v26 }
  0x21   :  { %4468 = vst [vmem:[#allocation46_spill] sm:$0xff] %v1909_v16  ;;  %4469 = vst [vmem:[#allocation47_spill] sm:$0xff] %v1914_v17  ;;  %v2079_v33 = vld [vmem:[%s4249_s1 + $0x150] sm:$0xff]  ;;  %v2084_v8 = vld [vmem:[%s4249_s1 + $0x158] sm:$0xff] }
  0x22   :  { %4470 = vst [vmem:[#allocation48_spill] sm:$0xff] %v1919_v18  ;;  %4471 = vst [vmem:[#allocation49_spill] sm:$0xff] %v1924_v19  ;;  %v2089_v9 = vld [vmem:[%s4249_s1 + $0x160] sm:$0xff]  ;;  %v2110_v51 = vld [vmem:[%s4249_s1 + $0x168] sm:$0xff]  ;;  %v2124_v18 = vsub.f32 %v1812_v54, %v1945_v24  ;;  %v2128_v19 = vsub.f32 %v1812_v54, %v1950_v25  ;;  %v2163_v54 = vsub.f32 %v1834_v59, %v1991_v38 }
  0x23   :  { %4472 = vst [vmem:[#allocation50_spill] sm:$0xff] %v1945_v24  ;;  %4473 = vst [vmem:[#allocation51_spill] sm:$0xff] %v1950_v25  ;;  %v2115_v16 = vld [vmem:[%s4249_s1 + $0x170] sm:$0xff]  ;;  %v2120_v17 = vld [vmem:[%s4249_s1 + $0x178] sm:$0xff] }
  0x24   :  { %4474 = vst [vmem:[#allocation52_spill] sm:$0xff] %v1955_v26  ;;  %4475 = vst [vmem:[#allocation53_spill] sm:$0xff] %v1960_v27  ;;  %v2141_v44 = vld [vmem:[%s4249_s1 + $0x180] sm:$0xff]  ;;  %v2146_v24 = vld [vmem:[%s4249_s1 + $0x188] sm:$0xff]  ;;  %v2155_v26 = vsub.f32 %v1834_v59, %v1981_v32  ;;  %v2159_v27 = vsub.f32 %v1834_v59, %v1986_v37  ;;  %v2194_v59 = vsub.f32 %v1836_v60, %v2027_v56 }
  0x25   :  { %4476 = vst [vmem:[#allocation54_spill] sm:$0xff] %v1981_v32  ;;  %4477 = vst [vmem:[#allocation55_spill] sm:$0xff] %v1986_v37  ;;  %v2151_v25 = vld [vmem:[%s4249_s1 + $0x190] sm:$0xff]  ;;  %v2172_v4 = vld [vmem:[%s4249_s1 + $0x198] sm:$0xff] }
  0x26   :  { %4478 = vst [vmem:[#allocation56_spill] sm:$0xff] %v1991_v38  ;;  %4479 = vst [vmem:[#allocation57_spill] sm:$0xff] %v1996_v50  ;;  %v2177_v32 = vld [vmem:[%s4249_s1 + $0x1a0] sm:$0xff]  ;;  %v2182_v37 = vld [vmem:[%s4249_s1 + $0x1a8] sm:$0xff]  ;;  %v2186_v38 = vsub.f32 %v1836_v60, %v2017_v41  ;;  %v2190_v50 = vsub.f32 %v1836_v60, %v2022_v55 }
  0x27   :  { %4480 = vst [vmem:[#allocation58_spill] sm:$0xff] %v2017_v41  ;;  %4481 = vst [vmem:[#allocation59_spill] sm:$0xff] %v2022_v55  ;;  %v2208_v41 = vld [vmem:[%s4249_s1 + $0x1b8] sm:$0xff]  ;;  %v2213_v55 = vld [vmem:[%s4249_s1 + $0x1c0] sm:$0xff] }
  0x28   :  { %4482 = vst [vmem:[#allocation60_spill] sm:$0xff] %v2027_v56  ;;  %4483 = vst [vmem:[#allocation61_spill] sm:$0xff] %v2048_v36  ;;  %v2217_v56 = vsub.f32 %v1838_v61, %v2053_v63 }
  0x29   :  { %4484 = vst [vmem:[#allocation62_spill] sm:$0xff] %v2053_v63  ;;  %4485 = vst [vmem:[#allocation63_spill] sm:$0xff] %v2058_v0  ;;  %v2239_v63 = vld [vmem:[%s4249_s1 + $0x1d0] sm:$0xff] }
  0x2a   :  { %4486 = vst [vmem:[#allocation64_spill] sm:$0xff] %v2079_v33  ;;  %4487 = vst [vmem:[#allocation65_spill] sm:$0xff] %v2084_v8 }
  0x2b   :  { %4488 = vst [vmem:[#allocation66_spill] sm:$0xff] %v2089_v9  ;;  %4489 = vst [vmem:[#allocation67_spill] sm:$0xff] %v2110_v51 }
  0x2c   :  { %4490 = vst [vmem:[#allocation68_spill] sm:$0xff] %v2115_v16  ;;  %4491 = vst [vmem:[#allocation69_spill] sm:$0xff] %v2120_v17 }
  0x2d   :  { %4492 = vst [vmem:[#allocation70_spill] sm:$0xff] %v2141_v44  ;;  %4493 = vst [vmem:[#allocation71_spill] sm:$0xff] %v2146_v24 }
  0x2e   :  { %4494 = vst [vmem:[#allocation72_spill] sm:$0xff] %v2151_v25  ;;  %4495 = vst [vmem:[#allocation73_spill] sm:$0xff] %v2163_v54  ;;  %v2203_v54 = vld [vmem:[%s4249_s1 + $0x1b0] sm:$0xff] }
  0x2f   :  { %4496 = vst [vmem:[#allocation74_spill] sm:$0xff] %v2167_v43  ;;  %4497 = vst [vmem:[#allocation75_spill] sm:$0xff] %v2172_v4  ;;  %v2198_v43 = vsub.f32 %v1836_v60, %v2048_v36  ;;  %v2221_v60 = vsub.f32 %v1838_v61, %v2058_v0  ;;  %v2225_v36 = vsub.f32 %v1838_v61, %v2079_v33  ;;  %v2244_v0 = vld [vmem:[%s4249_s1 + $0x1d8] sm:$0xff] }
  0x30   :  { %4498 = vst [vmem:[#allocation76_spill] sm:$0xff] %v2177_v32  ;;  %4499 = vst [vmem:[#allocation77_spill] sm:$0xff] %v2182_v37  ;;  %v2248_v33 = vsub.f32 %v1840_v62, %v2089_v9  ;;  %v2268_v9 = vsub.f32 %v1862_v3, %v2146_v24  ;;  %v2289_v24 = vsub.f32 %v1864_v5, %v2182_v37  ;;  %v2312_v37 = vld [vmem:[%s4249_s1 + $0x1f8] sm:$0xff] }
  0x31   :  { %4500 = vst [vmem:[#allocation78_spill] sm:$0xff] %v2194_v59  ;;  %4501 = vst [vmem:[#allocation79_spill] sm:$0xff] %v2198_v43  ;;  %v2229_v43 = vsub.f32 %v1838_v61, %v2084_v8  ;;  %v2234_v59 = vld [vmem:[%s4249_s1 + $0x1c8] sm:$0xff]  ;;  %v2252_v61 = vsub.f32 %v1840_v62, %v2110_v51  ;;  %v2256_v8 = vsub.f32 %v1840_v62, %v2115_v16 }
  0x32   :  { %4502 = vst [vmem:[#allocation80_spill] sm:$0xff] %v2203_v54  ;;  %4503 = vst [vmem:[#allocation81_spill] sm:$0xff] %v2208_v41  ;;  %v2272_v51 = vsub.f32 %v1862_v3, %v2151_v25  ;;  %v2276_v16 = vsub.f32 %v1862_v3, %v2172_v4  ;;  %v2293_v25 = vsub.f32 %v1864_v5, %v2203_v54  ;;  %v2302_v4 = vld [vmem:[%s4249_s1 + $0x1e8] sm:$0xff] }
  0x33   :  { %4504 = vst [vmem:[#allocation82_spill] sm:$0xff] %v2213_v55  ;;  %4505 = vst [vmem:[#allocation83_spill] sm:$0xff] %v2225_v36  ;;  %v2264_v36 = vsub.f32 %v1862_v3, %v2141_v44  ;;  %v2285_v44 = vsub.f32 %v1864_v5, %v2177_v32  ;;  %v2297_v3 = vsub.f32 %v1864_v5, %v2208_v41  ;;  %v2307_v32 = vld [vmem:[%s4249_s1 + $0x1f0] sm:$0xff] }
  0x34   :  { %4506 = vst [vmem:[#allocation84_spill] sm:$0xff] %v2229_v43  ;;  %4507 = vst [vmem:[#allocation85_spill] sm:$0xff] %v2234_v59  ;;  %v2260_v43 = vsub.f32 %v1840_v62, %v2120_v17  ;;  %v2281_v62 = vld [vmem:[%s4249_s1 + $0x1e0] sm:$0xff]  ;;  %v2316_v54 = vsub.f32 %v1866_v6, %v2213_v55  ;;  %v2320_v5 = vsub.f32 %v1866_v6, %v2234_v59 }
  0x35   :  { %4508 = vst [vmem:[#allocation86_spill] sm:$0xff] %v2239_v63  ;;  %4509 = vst [vmem:[#allocation87_spill] sm:$0xff] %v2244_v0  ;;  %v2324_v41 = vsub.f32 %v1866_v6, %v2239_v63  ;;  %v2328_v17 = vsub.f32 %v1866_v6, %v2244_v0  ;;  %v329_v55 = vmul.f32 %v1900_v14, %v1900_v14 }
  0x36   :  { %4510 = vst [vmem:[#allocation88_spill] sm:$0xff] %v2281_v62  ;;  %4511 = vst [vmem:[#allocation89_spill] sm:$0xff] %v2293_v25  ;;  %v328_v25 = vmul.f32 %v1896_v13, %v1896_v13  ;;  %v330_v59 = vmul.f32 %v1904_v15, %v1904_v15  ;;  %v331_v63 = vmul.f32 %v1928_v20, %v1928_v20 }
  0x37   :  { %4512 = vst [vmem:[#allocation90_spill] sm:$0xff] %v2297_v3  ;;  %4513 = vst [vmem:[#allocation91_spill] sm:$0xff] %v2302_v4  ;;  %v327_v3 = vmul.f32 %v1892_v12, %v1892_v12  ;;  %v333_v6 = vmul.f32 %v1936_v22, %v1936_v22  ;;  %v334_v12 = vmul.f32 %v1940_v23, %v1940_v23 }
  0x38   :  { %4514 = vst [vmem:[#allocation92_spill] sm:$0xff] %v2307_v32  ;;  %4515 = vst [vmem:[#allocation93_spill] sm:$0xff] %v2312_v37  ;;  %v2348_v13 = vsub.f32 %v1868_v7, %v2281_v62  ;;  %v2352_v14 = vsub.f32 %v1868_v7, %v2302_v4  ;;  %v2356_v15 = vsub.f32 %v1868_v7, %v2307_v32 }
  0x39   :  { %4516 = vst [vmem:[#allocation94_spill] sm:$0xff] %v2324_v41  ;;  %v332_v41 = vmul.f32 %v1932_v21, %v1932_v21  ;;  %v2360_v20 = vsub.f32 %v1868_v7, %v2312_v37  ;;  %v335_v21 = vmul.f32 %v1964_v28, %v1964_v28  ;;  %v336_v22 = vmul.f32 %v1968_v29, %v1968_v29 }
  0x3a   :  { %4517 = vst [vmem:[#allocation95_spill] sm:$0xff] %v2352_v14  ;;  %4518 = vst [vmem:[#allocation96_spill] sm:$0xff] %v2356_v15  ;;  %v337_v23 = vmul.f32 %v1972_v30, %v1972_v30  ;;  %v338_v4 = vmul.f32 %v1976_v31, %v1976_v31  ;;  %v339_v32 = vmul.f32 %v2000_v49, %v2000_v49 }
  0x3b   :  { %4519 = vst [vmem:[#allocation97_spill] sm:$0xff] %v2360_v20  ;;  %v340_v62 = vmul.f32 %v2004_v48, %v2004_v48  ;;  %v341_v7 = vmul.f32 %v2008_v47, %v2008_v47  ;;  %v342_v28 = vmul.f32 %v2012_v42, %v2012_v42  ;;  %v391_v37 = vadd.f32 %v331_v63, %v327_v3 }
  0x3c   :  { %v406_v29 = vadd.f32 %v332_v41, %v328_v25  ;;  %v421_v0 = vadd.f32 %v333_v6, %v329_v55  ;;  %v436_v20 = vadd.f32 %v334_v12, %v330_v59  ;;  %v343_v30 = vmul.f32 %v2031_v57, %v2031_v57 }
  0x3d   :  { %v344_v31 = vmul.f32 %v2035_v58, %v2035_v58  ;;  %v345_v49 = vmul.f32 %v2039_v40, %v2039_v40  ;;  %v346_v48 = vmul.f32 %v2043_v39, %v2043_v39  ;;  %v392_v47 = vadd.f32 %v391_v37, %v335_v21 }
  0x3e   :  { %v407_v15 = vadd.f32 %v406_v29, %v336_v22  ;;  %v422_v14 = vadd.f32 %v421_v0, %v337_v23  ;;  %v437_v42 = vadd.f32 %v436_v20, %v338_v4  ;;  %v347_v41 = vmul.f32 %v2062_v1, %v2062_v1 }
  0x3f   :  { %v348_v55 = vmul.f32 %v2066_v2, %v2066_v2  ;;  %v349_v57 = vmul.f32 %v2070_v35, %v2070_v35  ;;  %v350_v58 = vmul.f32 %v2074_v34, %v2074_v34  ;;  %v393_v40 = vadd.f32 %v392_v47, %v339_v32 }
  0x40   :  { %v408_v59 = vadd.f32 %v407_v15, %v340_v62  ;;  %v423_v63 = vadd.f32 %v422_v14, %v341_v7  ;;  %v438_v39 = vadd.f32 %v437_v42, %v342_v28  ;;  %v351_v0 = vmul.f32 %v2093_v10, %v2093_v10 }
  0x41   :  { %v352_v4 = vmul.f32 %v2097_v11, %v2097_v11  ;;  %v353_v1 = vmul.f32 %v2101_v52, %v2101_v52  ;;  %v354_v2 = vmul.f32 %v2105_v46, %v2105_v46  ;;  %v394_v35 = vadd.f32 %v393_v40, %v343_v30 }
  0x42   :  { %v409_v3 = vadd.f32 %v408_v59, %v344_v31  ;;  %v424_v6 = vadd.f32 %v423_v63, %v345_v49  ;;  %v439_v34 = vadd.f32 %v438_v39, %v346_v48  ;;  %v355_v62 = vmul.f32 %v2124_v18, %v2124_v18  ;;  %v4520_v18 = vld [vmem:[#allocation73_spill] sm:$0xff] }
  0x43   :  { %v356_v7 = vmul.f32 %v2128_v19, %v2128_v19  ;;  %v357_v10 = vmul.f32 %v2132_v53, %v2132_v53  ;;  %v358_v11 = vmul.f32 %v2136_v45, %v2136_v45  ;;  %v395_v52 = vadd.f32 %v394_v35, %v347_v41  ;;  %v4521_v19 = vld [vmem:[#allocation74_spill] sm:$0xff] }
  0x44   :  { %v410_v25 = vadd.f32 %v409_v3, %v348_v55  ;;  %v425_v32 = vadd.f32 %v424_v6, %v349_v57  ;;  %v440_v46 = vadd.f32 %v439_v34, %v350_v58  ;;  %v359_v37 = vmul.f32 %v2155_v26, %v2155_v26  ;;  %v4522_v26 = vld [vmem:[#allocation78_spill] sm:$0xff] }
  0x45   :  { %v360_v12 = vmul.f32 %v2159_v27, %v2159_v27  ;;  %v361_v14 = vmul.f32 %v4520_v18, %v4520_v18  ;;  %v362_v15 = vmul.f32 %v4521_v19, %v4521_v19  ;;  %v396_v53 = vadd.f32 %v395_v52, %v351_v0  ;;  %v4523_v27 = vld [vmem:[#allocation79_spill] sm:$0xff] }
  0x46   :  { %v411_v20 = vadd.f32 %v410_v25, %v352_v4  ;;  %v426_v21 = vadd.f32 %v425_v32, %v353_v1  ;;  %v441_v45 = vadd.f32 %v440_v46, %v354_v2  ;;  %v363_v22 = vmul.f32 %v2186_v38, %v2186_v38  ;;  %v4524_v38 = vld [vmem:[#allocation83_spill] sm:$0xff] }
  0x47   :  { %v364_v23 = vmul.f32 %v2190_v50, %v2190_v50  ;;  %v365_v28 = vmul.f32 %v4522_v26, %v4522_v26  ;;  %v366_v29 = vmul.f32 %v4523_v27, %v4523_v27  ;;  %v397_v30 = vadd.f32 %v396_v53, %v355_v62  ;;  %v4525_v50 = vld [vmem:[#allocation84_spill] sm:$0xff]  ;;  %v4529_v53 = vld [vmem:[#allocation95_spill] sm:$0xff] }
  0x48   :  { %v412_v31 = vadd.f32 %v411_v20, %v356_v7  ;;  %v427_v49 = vadd.f32 %v426_v21, %v357_v10  ;;  %v442_v48 = vadd.f32 %v441_v45, %v358_v11  ;;  %v367_v47 = vmul.f32 %v2217_v56, %v2217_v56 }
  0x49   :  { %v368_v42 = vmul.f32 %v2221_v60, %v2221_v60  ;;  %v369_v41 = vmul.f32 %v4524_v38, %v4524_v38  ;;  %v370_v55 = vmul.f32 %v4525_v50, %v4525_v50  ;;  %v398_v57 = vadd.f32 %v397_v30, %v359_v37 }
  0x4a   :  { %v413_v58 = vadd.f32 %v412_v31, %v360_v12  ;;  %v428_v40 = vadd.f32 %v427_v49, %v361_v14  ;;  %v443_v59 = vadd.f32 %v442_v48, %v362_v15  ;;  %v371_v63 = vmul.f32 %v2248_v33, %v2248_v33 }
  0x4b   :  { %v372_v39 = vmul.f32 %v2252_v61, %v2252_v61  ;;  %v373_v56 = vmul.f32 %v2256_v8, %v2256_v8  ;;  %v374_v60 = vmul.f32 %v2260_v43, %v2260_v43  ;;  %v399_v0 = vadd.f32 %v398_v57, %v363_v22 }
  0x4c   :  { %v414_v4 = vadd.f32 %v413_v58, %v364_v23  ;;  %v429_v1 = vadd.f32 %v428_v40, %v365_v28  ;;  %v444_v2 = vadd.f32 %v443_v59, %v366_v29  ;;  %v375_v35 = vmul.f32 %v2264_v36, %v2264_v36  ;;  %v4526_v36 = vld [vmem:[#allocation89_spill] sm:$0xff] }
  0x4d   :  { %v376_v3 = vmul.f32 %v2268_v9, %v2268_v9  ;;  %v377_v33 = vmul.f32 %v2272_v51, %v2272_v51  ;;  %v378_v61 = vmul.f32 %v2276_v16, %v2276_v16  ;;  %v400_v8 = vadd.f32 %v399_v0, %v367_v47  ;;  %v4527_v9 = vld [vmem:[#allocation90_spill] sm:$0xff]  ;;  %v4532_v40 = vld [vmem:[#allocation5_spill] sm:$0xff] }
  0x4e   :  { %v415_v6 = vadd.f32 %v414_v4, %v368_v42  ;;  %v430_v34 = vadd.f32 %v429_v1, %v369_v41  ;;  %v445_v43 = vadd.f32 %v444_v2, %v370_v55  ;;  %v379_v62 = vmul.f32 %v2285_v44, %v2285_v44  ;;  %v4528_v44 = vld [vmem:[#allocation94_spill] sm:$0xff] }
  0x4f   :  { %v380_v7 = vmul.f32 %v2289_v24, %v2289_v24  ;;  %v381_v10 = vmul.f32 %v4526_v36, %v4526_v36  ;;  %v382_v11 = vmul.f32 %v4527_v9, %v4527_v9  ;;  %v401_v51 = vadd.f32 %v400_v8, %v371_v63 }
  0x50   :  { %v416_v52 = vadd.f32 %v415_v6, %v372_v39  ;;  %v431_v25 = vadd.f32 %v430_v34, %v373_v56  ;;  %v446_v16 = vadd.f32 %v445_v43, %v374_v60  ;;  %v383_v32 = vmul.f32 %v2316_v54, %v2316_v54  ;;  %v4530_v54 = vld [vmem:[#allocation96_spill] sm:$0xff] }
  0x51   :  { %v384_v46 = vmul.f32 %v2320_v5, %v2320_v5  ;;  %v385_v37 = vmul.f32 %v4528_v44, %v4528_v44  ;;  %v386_v24 = vmul.f32 %v2328_v17, %v2328_v17  ;;  %v402_v12 = vadd.f32 %v401_v51, %v375_v35  ;;  %v4531_v5 = vld [vmem:[#allocation97_spill] sm:$0xff]  ;;  %v4538_v44 = vld [vmem:[#allocation15_spill] sm:$0xff] }
  0x52   :  { %v417_v18 = vadd.f32 %v416_v52, %v376_v3  ;;  %v432_v14 = vadd.f32 %v431_v25, %v377_v33  ;;  %v447_v19 = vadd.f32 %v446_v16, %v378_v61  ;;  %v387_v15 = vmul.f32 %v2348_v13, %v2348_v13  ;;  %v4533_v52 = vld [vmem:[#allocation14_spill] sm:$0xff] }
  0x53   :  { %v388_v20 = vmul.f32 %v4529_v53, %v4529_v53  ;;  %v389_v21 = vmul.f32 %v4530_v54, %v4530_v54  ;;  %v390_v45 = vmul.f32 %v4531_v5, %v4531_v5  ;;  %v403_v22 = vadd.f32 %v402_v12, %v379_v62  ;;  %v4548_v54 = vld [vmem:[#allocation22_spill] sm:$0xff] }
  0x54   :  { %v418_v23 = vadd.f32 %v417_v18, %v380_v7  ;;  %v433_v26 = vadd.f32 %v432_v14, %v381_v10  ;;  %v448_v17 = vadd.f32 %v447_v19, %v382_v11  ;;  %v462_v59 = vadd.s32 8, %v4532_v40  ;;  %v4543_v14 = vld [vmem:[#allocation16_spill] sm:$0xff] }
  0x55   :  { %v404_v28 = vadd.f32 %v403_v22, %v383_v32  ;;  %v463_v63 = vadd.s32 16, %v4532_v40  ;;  %v464_v39 = vadd.s32 24, %v4532_v40  ;;  %v1688_v62 = vmov 0.0  }
  0x56   :  { %v419_v27 = vadd.f32 %v418_v23, %v384_v46  ;;  %v434_v29 = vadd.f32 %v433_v26, %v385_v37  ;;  %v449_v30 = vadd.f32 %v448_v17, %v386_v24  ;;  %v4553_v23 = vld [vmem:[#allocation17_spill] sm:$0xff] }
  0x57   :  { %v405_v31 = vadd.f32 %v404_v28, %v387_v15 }
  0x58   :  { %v420_v49 = vadd.f32 %v419_v27, %v388_v20  ;;  %v435_v13 = vadd.f32 %v434_v29, %v389_v21  ;;  %v450_v48 = vadd.f32 %v449_v30, %v390_v45  ;;  %v4557_v29 = vld [vmem:[#allocation23_spill] sm:$0xff] }
  0x5a   :  { %v451_v47 = vmin.f32 %v405_v31, %v420_v49  ;;  %v452_v42 = vmin.f32 %v435_v13, %v450_v48 }
  0x5c   :  { %v453_v38 = vmin.f32 %v451_v47, %v452_v42 }
  0x5e   :  { %v454_v41 = vrot.slane %v453_v38, 4 }
  0x60   :  { %v455_v50 = vmin.f32 %v453_v38, %v454_v41 }
  0x62   :  { %v456_v55 = vrot.slane %v455_v50, 2 }
  0x64   :  { %v457_v57 = vmin.f32 %v455_v50, %v456_v55  ;;  %v4562_v50 = vld [vmem:[#allocation25_spill] sm:$0xff] }
  0x66   :  { %v458_v58 = vrot.slane %v457_v57, 1 }
  0x68   :  { %v459_v56 = vmin.f32 %v457_v57, %v458_v58 }
  0x6a   :  { %vm465_vm0 = vcmp.le.f32.partialorder %v405_v31, %v459_v56  ;;  %vm466_vm1 = vcmp.le.f32.partialorder %v420_v49, %v459_v56  ;;  %vm467_vm2 = vcmp.le.f32.partialorder %v435_v13, %v459_v56  ;;  %vm468_vm3 = vcmp.le.f32.partialorder %v450_v48, %v459_v56  ;;  %v4559_v48 = vld [vmem:[#allocation24_spill] sm:$0xff] }
  0x6b   :  { %v469_v60 = vsel %vm465_vm0, %v4532_v40, 32  ;;  %v470_v0 = vsel %vm466_vm1, %v462_v59, 32  ;;  %v471_v4 = vsel %vm467_vm2, %v463_v63, 32  ;;  %v472_v1 = vsel %vm468_vm3, %v464_v39, 32 }
  0x6c   :  { %vm473_vm4 = vcmp.lt.s32.totalorder %v469_v60, %v470_v0  ;;  %vm475_vm5 = vcmp.lt.s32.totalorder %v471_v4, %v472_v1  ;;  %vm732_vm0 = vcmask 1043459   ;;  %vm734_vm1 = vcmask 1044484  }
  0x6d   :  { %v474_v2 = vsel %vm473_vm4, %v469_v60, %v470_v0  ;;  %v476_v35 = vsel %vm475_vm5, %v471_v4, %v472_v1  ;;  %v4572_v0 = vld [vmem:[#allocation6_spill] sm:$0xff]  ;;  %v4573_v1 = vld [vmem:[#allocation7_spill] sm:$0xff]  ;;  %vm736_vm2 = vcmask 1045509   ;;  %vm738_vm3 = vcmask 1046534  }
  0x6e   :  { %vm477_vm6 = vcmp.lt.s32.totalorder %v474_v2, %v476_v35  ;;  %vm740_vm4 = vcmask 1047559   ;;  %vm909_vm5 = vcmask 130048  }
  0x6f   :  { %v478_v3 = vsel %vm477_vm6, %v474_v2, %v476_v35  ;;  %v4574_v35 = vld [vmem:[#allocation8_spill] sm:$0xff] }
  0x70   :  { %v479_v33 = vrot.slane %v478_v3, 4 }
  0x72   :  { %vm480_vm7 = vcmp.lt.s32.totalorder %v478_v3, %v479_v33 }
  0x73   :  { %v481_v61 = vsel %vm480_vm7, %v478_v3, %v479_v33  ;;  %v4575_v33 = vld [vmem:[#allocation9_spill] sm:$0xff] }
  0x74   :  { %v482_v8 = vrot.slane %v481_v61, 2 }
  0x76   :  { %vm483_vm8 = vcmp.lt.s32.totalorder %v481_v61, %v482_v8 }
  0x77   :  { %v484_v6 = vsel %vm483_vm8, %v481_v61, %v482_v8  ;;  %v4576_v8 = vld [vmem:[#allocation10_spill] sm:$0xff] }
  0x78   :  { %v485_v34 = vrot.slane %v484_v6, 1 }
  0x7a   :  { %vm486_vm9 = vcmp.lt.s32.totalorder %v484_v6, %v485_v34 }
  0x7b   :  { %v487_v43 = vsel %vm486_vm9, %v484_v6, %v485_v34  ;;  %v4577_v34 = vld [vmem:[#allocation11_spill] sm:$0xff] }
  0x7c   :  { %vm490_vm10 = vcmp.eq.s32.totalorder %v463_v63, %v487_v43  ;;  %vm491_vm11 = vcmp.eq.s32.totalorder %v464_v39, %v487_v43  ;;  %vm488_vm12 = vcmp.eq.s32.totalorder %v4532_v40, %v487_v43  ;;  %vm489_vm13 = vcmp.eq.s32.totalorder %v462_v59, %v487_v43  ;;  %v4567_v59 = vld [vmem:[#allocation30_spill] sm:$0xff] }
  0x7d   :  { %v2479_v7 = vsel %vm490_vm10, 1.0, %v1688_v62  ;;  %v2481_v36 = vsel %vm491_vm11, 1.0, %v1688_v62  ;;  %v2483_v10 = vsel %vm488_vm12, 1.0, %v1688_v62  ;;  %v2485_v9 = vsel %vm489_vm13, 1.0, %v1688_v62  ;;  %v4578_v62 = vld [vmem:[#allocation12_spill] sm:$0xff] }
  0x7e   :  { %v1664_v11 = vpack.i.bf16 %v2481_v36, %v2479_v7  ;;  %502 = vst [vmem:[%s4251_s3 + $0x10] sm:$0xff] %v2479_v7  ;;  %503 = vst [vmem:[%s4251_s3 + $0x18] sm:$0xff] %v2481_v36  ;;  %v1659_v51 = vpack.i.bf16 %v2485_v9, %v2483_v10  ;;  %v2511_v25 = vmul.f32 %v2485_v9, %v4533_v52 }
  0x7f   :  { %500 = vst [vmem:[%s4251_s3] sm:$0xff] %v2483_v10  ;;  %501 = vst [vmem:[%s4251_s3 + $0x8] sm:$0xff] %v2485_v9  ;;  %v2515_v16 = vmul.f32 %v2483_v10, %v4533_v52  ;;  %v2523_v32 = vmul.f32 %v2481_v36, %v4533_v52  ;;  %v2527_v46 = vmul.f32 %v2479_v7, %v4533_v52 }
  0x80   :  { %1665 = vrot.lane.b32.xlu1 %v1664_v11, %s1689_s16  ;;  %1660 = vrot.lane.b32.xlu0 %v1659_v51, %s1689_s16  ;;  %4534 = vst [vmem:[#allocation73_spill] sm:$0xff] %v2511_v25  ;;  %v2535_v37 = vmul.f32 %v2485_v9, %v4538_v44  ;;  %v2539_v24 = vmul.f32 %v2483_v10, %v4538_v44  ;;  %v4579_v51 = vld [vmem:[#allocation13_spill] sm:$0xff] }
  0x81   :  { %4535 = vst [vmem:[#allocation74_spill] sm:$0xff] %v2515_v16  ;;  %4536 = vst [vmem:[#allocation78_spill] sm:$0xff] %v2523_v32  ;;  %v2547_v12 = vmul.f32 %v2481_v36, %v4538_v44  ;;  %v2551_v18 = vmul.f32 %v2479_v7, %v4538_v44  ;;  %v2555_v19 = vmul.f32 %v2485_v9, %v4543_v14  ;;  %v4580_v44 = vld [vmem:[#allocation18_spill] sm:$0xff] }
  0x82   :  { %4537 = vst [vmem:[#allocation79_spill] sm:$0xff] %v2527_v46  ;;  %4539 = vst [vmem:[#allocation83_spill] sm:$0xff] %v2535_v37  ;;  %v2563_v15 = vmul.f32 %v2483_v10, %v4543_v14  ;;  %v2567_v53 = vmul.f32 %v2481_v36, %v4543_v14  ;;  %v2571_v20 = vmul.f32 %v2479_v7, %v4543_v14 }
  0x83   :  { %4540 = vst [vmem:[#allocation84_spill] sm:$0xff] %v2539_v24  ;;  %4541 = vst [vmem:[#allocation89_spill] sm:$0xff] %v2547_v12  ;;  %v2575_v21 = vmul.f32 %v2485_v9, %v4548_v54  ;;  %v2579_v5 = vmul.f32 %v2483_v10, %v4548_v54  ;;  %v2583_v45 = vmul.f32 %v2481_v36, %v4548_v54 }
  0x84   :  { %980 = vrot.lane.b32.xlu1 %v2511_v25, %s1689_s16  ;;  %978 = vrot.lane.b32.xlu0 %v2515_v16, %s1689_s16  ;;  %4542 = vst [vmem:[#allocation90_spill] sm:$0xff] %v2551_v18  ;;  %4544 = vst [vmem:[#allocation94_spill] sm:$0xff] %v2555_v19  ;;  %v2587_v22 = vmul.f32 %v2479_v7, %v4548_v54  ;;  %v2591_v26 = vmul.f32 %v2485_v9, %v4553_v23  ;;  %v4581_v54 = vld [vmem:[#allocation19_spill] sm:$0xff] }
  0x85   :  { %4545 = vst [vmem:[#allocation95_spill] sm:$0xff] %v2563_v15  ;;  %4546 = vst [vmem:[#allocation96_spill] sm:$0xff] %v2567_v53  ;;  %v2595_v17 = vmul.f32 %v2483_v10, %v4553_v23  ;;  %v2599_v28 = vmul.f32 %v2481_v36, %v4553_v23  ;;  %v2603_v27 = vmul.f32 %v2479_v7, %v4553_v23 }
  0x86   :  { %4547 = vst [vmem:[#allocation97_spill] sm:$0xff] %v2571_v20  ;;  %4549 = vst [vmem:[#allocation5_spill] sm:$0xff] %v2575_v21  ;;  %v2607_v30 = vmul.f32 %v2485_v9, %v4557_v29  ;;  %v2611_v31 = vmul.f32 %v2483_v10, %v4557_v29  ;;  %v2615_v49 = vmul.f32 %v2481_v36, %v4557_v29 }
  0x87   :  { %4550 = vst [vmem:[#allocation14_spill] sm:$0xff] %v2579_v5  ;;  %4551 = vst [vmem:[#allocation15_spill] sm:$0xff] %v2583_v45  ;;  %v2619_v13 = vmul.f32 %v2479_v7, %v4557_v29  ;;  %v2627_v47 = vmul.f32 %v2485_v9, %v4559_v48  ;;  %v2631_v42 = vmul.f32 %v2483_v10, %v4559_v48  ;;  %v4582_v29 = vld [vmem:[#allocation20_spill] sm:$0xff] }
  0x88   :  { %984 = vrot.lane.b32.xlu1 %v2523_v32, %s1689_s16  ;;  %982 = vrot.lane.b32.xlu0 %v2527_v46, %s1689_s16  ;;  %4552 = vst [vmem:[#allocation16_spill] sm:$0xff] %v2587_v22  ;;  %4554 = vst [vmem:[#allocation22_spill] sm:$0xff] %v2591_v26  ;;  %v2635_v38 = vmul.f32 %v2481_v36, %v4559_v48  ;;  %v2639_v41 = vmul.f32 %v2479_v7, %v4559_v48  ;;  %v4595_v46 = vld [vmem:[#allocation45_spill] sm:$0xff] }
  0x89   :  { %4555 = vst [vmem:[#allocation17_spill] sm:$0xff] %v2595_v17  ;;  %4556 = vst [vmem:[#allocation98_spill] sm:$0xff] %v2603_v27  ;;  %v2643_v55 = vmul.f32 %v2485_v9, %v4562_v50  ;;  %v2647_v57 = vmul.f32 %v2483_v10, %v4562_v50  ;;  %v2651_v58 = vmul.f32 %v2481_v36, %v4562_v50 }
  0x8a   :  { %4558 = vst [vmem:[#allocation23_spill] sm:$0xff] %v2611_v31  ;;  %4560 = vst [vmem:[#allocation24_spill] sm:$0xff] %v2635_v38  ;;  %v2655_v40 = vmul.f32 %v2479_v7, %v4562_v50  ;;  %v2659_v63 = vmul.f32 %v2485_v9, %v4567_v59  ;;  %v2663_v39 = vmul.f32 %v2483_v10, %v4567_v59  ;;  %v4583_v50 = vld [vmem:[#allocation21_spill] sm:$0xff] }
  0x8b   :  { %4561 = vst [vmem:[#allocation99_spill] sm:$0xff] %v2639_v41  ;;  %4563 = vst [vmem:[#allocation25_spill] sm:$0xff] %v2643_v55  ;;  %v2667_v56 = vmul.f32 %v2481_v36, %v4567_v59  ;;  %v2671_v60 = vmul.f32 %v2479_v7, %v4567_v59  ;;  %v504_v4 = vmul.f32 %v2483_v10, %v4572_v0  ;;  %v4584_v0 = vld [vmem:[#allocation26_spill] sm:$0xff] }
  0x8c   :  { %988 = vrot.lane.b32.xlu1 %v2535_v37, %s1689_s16  ;;  %986 = vrot.lane.b32.xlu0 %v2539_v24, %s1689_s16  ;;  %4564 = vst [vmem:[#allocation100_spill] sm:$0xff] %v2647_v57  ;;  %4565 = vst [vmem:[#allocation101_spill] sm:$0xff] %v2651_v58  ;;  %v505_v2 = vmul.f32 %v2485_v9, %v4573_v1  ;;  %v506_v3 = vmul.f32 %v2479_v7, %v4574_v35  ;;  %v4585_v35 = vld [vmem:[#allocation27_spill] sm:$0xff]  ;;  %v4618_v41 = vld [vmem:[#allocation66_spill] sm:$0xff] }
  0x8d   :  { %4566 = vst [vmem:[#allocation102_spill] sm:$0xff] %v2655_v40  ;;  %4568 = vst [vmem:[#allocation30_spill] sm:$0xff] %v2659_v63  ;;  %v507_v61 = vmul.f32 %v2481_v36, %v4575_v33  ;;  %v508_v6 = vmul.f32 %v2483_v10, %v4576_v8  ;;  %v509_v43 = vmul.f32 %v2485_v9, %v4577_v34  ;;  %v4586_v8 = vld [vmem:[#allocation28_spill] sm:$0xff]  ;;  %v4601_v37 = vld [vmem:[#allocation51_spill] sm:$0xff] }
  0x8e   :  { %4569 = vst [vmem:[#allocation103_spill] sm:$0xff] %v2663_v39  ;;  %4570 = vst [vmem:[#allocation104_spill] sm:$0xff] %v2667_v56  ;;  %v510_v11 = vmul.f32 %v2479_v7, %v4578_v62  ;;  %v511_v52 = vmul.f32 %v2481_v36, %v4579_v51  ;;  %v512_v14 = vmul.f32 %v2483_v10, %v4580_v44  ;;  %v4587_v62 = vld [vmem:[#allocation29_spill] sm:$0xff]  ;;  %v4588_v44 = vld [vmem:[#allocation34_spill] sm:$0xff] }
  0x8f   :  { %4571 = vst [vmem:[#allocation105_spill] sm:$0xff] %v2671_v60  ;;  %v513_v23 = vmul.f32 %v2485_v9, %v4581_v54  ;;  %v514_v48 = vmul.f32 %v2479_v7, %v4582_v29  ;;  %v515_v59 = vmul.f32 %v2481_v36, %v4583_v50  ;;  %v516_v1 = vmul.f32 %v2483_v10, %v4584_v0  ;;  %v4589_v29 = vld [vmem:[#allocation35_spill] sm:$0xff]  ;;  %v4590_v50 = vld [vmem:[#allocation36_spill] sm:$0xff]  ;;  %v4613_v39 = vld [vmem:[#allocation62_spill] sm:$0xff] }
  0x90   :  { %992 = vrot.lane.b32.xlu1 %v2547_v12, %s1689_s16  ;;  %990 = vrot.lane.b32.xlu0 %v2551_v18, %s1689_s16  ;;  %v517_v33 = vmul.f32 %v2485_v9, %v4585_v35  ;;  %v518_v34 = vmul.f32 %v2479_v7, %v4586_v8  ;;  %v2709_v51 = vmul.f32 %v2481_v36, %v4587_v62  ;;  %v4591_v35 = vld [vmem:[#allocation37_spill] sm:$0xff]  ;;  %v4592_v62 = vld [vmem:[#allocation42_spill] sm:$0xff]  ;;  %v4614_v63 = vld [vmem:[#allocation63_spill] sm:$0xff] }
  0x91   :  { %v520_v54 = vmul.f32 %v2483_v10, %v4588_v44  ;;  %v522_v0 = vmul.f32 %v2479_v7, %v4590_v50  ;;  %v2723_v8 = vmul.f32 %v2481_v36, %v4591_v35  ;;  %v4593_v44 = vld [vmem:[#allocation43_spill] sm:$0xff]  ;;  %v2733_v16 = vmul.f32 %v2481_v36, %v4595_v46 }
  0x92   :  { %v525_v18 = vmul.f32 %v2485_v9, %v4593_v44  ;;  %v4600_v44 = vld [vmem:[#allocation50_spill] sm:$0xff]  ;;  %v533_v46 = vmul.f32 %v2485_v9, %v4601_v37  ;;  %v568_v32 = vadd.f32 %v505_v2, %v504_v4  ;;  %v577_v25 = vadd.f32 %v509_v43, %v508_v6  ;;  %v4605_v37 = vld [vmem:[#allocation55_spill] sm:$0xff]  ;;  %v4606_v2 = vld [vmem:[#allocation56_spill] sm:$0xff] }
  0x93   :  { %v586_v60 = vadd.f32 %v513_v23, %v512_v14  ;;  %v2765_v4 = vmul.f32 %v2485_v9, %v4605_v37  ;;  %v2769_v6 = vmul.f32 %v2479_v7, %v4606_v2  ;;  %v4607_v43 = vld [vmem:[#allocation57_spill] sm:$0xff]  ;;  %v4608_v23 = vld [vmem:[#allocation58_spill] sm:$0xff]  ;;  %v545_v40 = vmul.f32 %v2485_v9, %v4614_v63 }
  0x94   :  { %996 = vrot.lane.b32.xlu1 %v2555_v19, %s1689_s16  ;;  %994 = vrot.lane.b32.xlu0 %v2563_v15, %s1689_s16  ;;  %v524_v15 = vmul.f32 %v2483_v10, %v4592_v62  ;;  %v4599_v62 = vld [vmem:[#allocation49_spill] sm:$0xff]  ;;  %v2773_v14 = vmul.f32 %v2481_v36, %v4607_v43  ;;  %v544_v43 = vmul.f32 %v2483_v10, %v4613_v39 }
  0x95   :  { %v2743_v12 = vmul.f32 %v2481_v36, %v4599_v62  ;;  %v578_v58 = vadd.f32 %v577_v25, %v510_v11  ;;  %v587_v57 = vadd.f32 %v586_v60, %v514_v48  ;;  %v595_v39 = vadd.f32 %v517_v33, %v516_v1  ;;  %v4620_v60 = vld [vmem:[#allocation68_spill] sm:$0xff]  ;;  %v4621_v11 = vld [vmem:[#allocation69_spill] sm:$0xff] }
  0x96   :  { %v548_v63 = vmul.f32 %v2483_v10, %v4618_v41  ;;  %v2813_v48 = vmul.f32 %v2481_v36, %v4621_v11  ;;  %v613_v33 = vadd.f32 %v525_v18, %v524_v15  ;;  %v4626_v11 = vld [vmem:[#allocation75_spill] sm:$0xff]  ;;  %v4628_v15 = vld [vmem:[#allocation77_spill] sm:$0xff] }
  0x97   :  { %v579_v41 = vadd.f32 %v578_v58, %v511_v52 }
  0x98   :  { %1000 = vrot.lane.b32.xlu1 %v2567_v53, %s1689_s16  ;;  %998 = vrot.lane.b32.xlu0 %v2571_v20, %s1689_s16  ;;  %v521_v20 = vmul.f32 %v2485_v9, %v4589_v29  ;;  %v4594_v29 = vld [vmem:[#allocation44_spill] sm:$0xff]  ;;  %4622 = vst [vmem:[#allocation8_spill] sm:$0xff] %v2813_v48  ;;  %v596_v48 = vadd.f32 %v595_v39, %v518_v34 }
  0x99   :  { %v526_v24 = vmul.f32 %v2479_v7, %v4594_v29  ;;  %v4598_v53 = vld [vmem:[#allocation48_spill] sm:$0xff]  ;;  %v532_v29 = vmul.f32 %v2483_v10, %v4600_v44  ;;  %v4604_v44 = vld [vmem:[#allocation54_spill] sm:$0xff]  ;;  %v580_v34 = vrot.slane %v579_v41, 4 }
  0x9a   :  { %v530_v19 = vmul.f32 %v2479_v7, %v4598_v53  ;;  %v4602_v53 = vld [vmem:[#allocation52_spill] sm:$0xff]  ;;  %v2761_v56 = vmul.f32 %v2483_v10, %v4604_v44  ;;  %v604_v1 = vadd.f32 %v521_v20, %v520_v54  ;;  %v557_v20 = vmul.f32 %v2485_v9, %v4628_v15 }
  0x9c   :  { %1004 = vrot.lane.b32.xlu1 %v2575_v21, %s1689_s16  ;;  %1002 = vrot.lane.b32.xlu0 %v2579_v5, %s1689_s16  ;;  %v4596_v5 = vld [vmem:[#allocation46_spill] sm:$0xff]  ;;  %v4597_v21 = vld [vmem:[#allocation47_spill] sm:$0xff] }
  0x9d   :  { %v528_v50 = vmul.f32 %v2483_v10, %v4596_v5  ;;  %v529_v35 = vmul.f32 %v2485_v9, %v4597_v21  ;;  %v534_v21 = vmul.f32 %v2479_v7, %v4602_v53  ;;  %v4603_v5 = vld [vmem:[#allocation53_spill] sm:$0xff]  ;;  %v2777_v53 = vmul.f32 %v2483_v10, %v4608_v23 }
  0x9e   :  { %v2757_v62 = vmul.f32 %v2481_v36, %v4603_v5  ;;  %v4609_v5 = vld [vmem:[#allocation59_spill] sm:$0xff]  ;;  %v569_v23 = vadd.f32 %v568_v32, %v506_v3  ;;  %v550_v3 = vmul.f32 %v2479_v7, %v4620_v60 }
  0x9f   :  { %v2781_v44 = vmul.f32 %v2485_v9, %v4609_v5  ;;  %v4619_v32 = vld [vmem:[#allocation67_spill] sm:$0xff] }
  0xa0   :  { %1008 = vrot.lane.b32.xlu1 %v2583_v45, %s1689_s16  ;;  %1006 = vrot.lane.b32.xlu0 %v2587_v22, %s1689_s16  ;;  %v4610_v22 = vld [vmem:[#allocation60_spill] sm:$0xff]  ;;  %v4611_v45 = vld [vmem:[#allocation61_spill] sm:$0xff]  ;;  %v549_v25 = vmul.f32 %v2485_v9, %v4619_v32  ;;  %v570_v38 = vadd.f32 %v569_v23, %v507_v61  ;;  %v631_v23 = vadd.f32 %v533_v46, %v532_v29 }
  0xa1   :  { %v2785_v37 = vmul.f32 %v2479_v7, %v4610_v22  ;;  %v2789_v2 = vmul.f32 %v2481_v36, %v4611_v45  ;;  %v4615_v22 = vld [vmem:[#allocation64_spill] sm:$0xff]  ;;  %v4616_v45 = vld [vmem:[#allocation65_spill] sm:$0xff] }
  0xa2   :  { %v546_v5 = vmul.f32 %v2479_v7, %v4615_v22  ;;  %v2803_v55 = vmul.f32 %v2481_v36, %v4616_v45  ;;  %v4625_v32 = vld [vmem:[#allocation72_spill] sm:$0xff]  ;;  %v4630_v61 = vld [vmem:[#allocation81_spill] sm:$0xff] }
  0xa3   :  { %4612 = vst [vmem:[#allocation6_spill] sm:$0xff] %v2789_v2  ;;  %v622_v2 = vadd.f32 %v529_v35, %v528_v50  ;;  %v554_v60 = vmul.f32 %v2479_v7, %v4625_v32  ;;  %v559_v52 = vmul.f32 %v2481_v36, %v4630_v61  ;;  %v605_v50 = vadd.f32 %v604_v1, %v522_v0  ;;  %v4635_v46 = vld [vmem:[#allocation88_spill] sm:$0xff] }
  0xa4   :  { %1012 = vrot.lane.b32.xlu1 %v2591_v26, %s1689_s16  ;;  %1010 = vrot.lane.b32.xlu0 %v2595_v17, %s1689_s16  ;;  %4617 = vst [vmem:[#allocation7_spill] sm:$0xff] %v2803_v55  ;;  %v4623_v17 = vld [vmem:[#allocation70_spill] sm:$0xff]  ;;  %v4624_v26 = vld [vmem:[#allocation71_spill] sm:$0xff]  ;;  %v588_v55 = vadd.f32 %v587_v57, %v515_v59  ;;  %v4629_v57 = vld [vmem:[#allocation80_spill] sm:$0xff]  ;;  %v614_v35 = vadd.f32 %v613_v33, %v526_v24  ;;  %v571_v32 = vrot.slane %v570_v38, 4 }
  0xa5   :  { %v552_v22 = vmul.f32 %v2483_v10, %v4623_v17  ;;  %v553_v45 = vmul.f32 %v2485_v9, %v4624_v26  ;;  %v555_v17 = vmul.f32 %v2481_v36, %v4626_v11  ;;  %v4627_v26 = vld [vmem:[#allocation76_spill] sm:$0xff]  ;;  %v558_v58 = vmul.f32 %v2479_v7, %v4629_v57  ;;  %v4631_v59 = vld [vmem:[#allocation82_spill] sm:$0xff]  ;;  %v4634_v24 = vld [vmem:[#allocation87_spill] sm:$0xff] }
  0xa6   :  { %v556_v18 = vmul.f32 %v2483_v10, %v4627_v26  ;;  %v560_v54 = vmul.f32 %v2483_v10, %v4631_v59  ;;  %v589_v39 = vrot.slane %v588_v55, 4  ;;  %v623_v11 = vadd.f32 %v622_v2, %v530_v19  ;;  %v4632_v26 = vld [vmem:[#allocation85_spill] sm:$0xff]  ;;  %v4633_v57 = vld [vmem:[#allocation86_spill] sm:$0xff]  ;;  %v4636_v2 = vld [vmem:[#allocation91_spill] sm:$0xff] }
  0xa7   :  { %v561_v15 = vmul.f32 %v2485_v9, %v4632_v26  ;;  %v562_v61 = vmul.f32 %v2479_v7, %v4633_v57  ;;  %v2846_v0 = vadd.f32 %v596_v48, %v2709_v51  ;;  %v563_v29 = vmul.f32 %v2481_v36, %v4634_v24  ;;  %v4637_v33 = vld [vmem:[#allocation92_spill] sm:$0xff] }
  0xa8   :  { %1016 = vrot.lane.b32.xlu1 %v2599_v28, %s1689_s16  ;;  %1014 = vrot.lane.b32.xlu0 %v2603_v27, %s1689_s16  ;;  %v564_v19 = vmul.f32 %v2483_v10, %v4635_v46  ;;  %v565_v1 = vmul.f32 %v2485_v9, %v4636_v2  ;;  %v566_v59 = vmul.f32 %v2479_v7, %v4637_v33 }
  0xa9   :  { %v2861_v57 = vadd.f32 %v605_v50, %v2723_v8  ;;  %v2864_v51 = vadd.f32 %v614_v35, %v2733_v16  ;;  %v632_v48 = vadd.f32 %v631_v23, %v534_v21  ;;  %v2866_v24 = vadd.f32 %v571_v32, %v570_v38 }
  0xaa   :  { %v2868_v46 = vadd.f32 %v580_v34, %v579_v41  ;;  %v2870_v27 = vadd.f32 %v589_v39, %v588_v55  ;;  %v2873_v2 = vadd.f32 %v623_v11, %v2743_v12  ;;  %v640_v16 = vadd.f32 %v2765_v4, %v2761_v56  ;;  %v4639_v4 = vld [vmem:[#allocation6_spill] sm:$0xff] }
  0xab   :  { %v649_v38 = vadd.f32 %v2781_v44, %v2777_v53  ;;  %v658_v8 = vadd.f32 %v545_v40, %v544_v43  ;;  %v667_v55 = vadd.f32 %v549_v25, %v548_v63  ;;  %v676_v21 = vadd.f32 %v553_v45, %v552_v22 }
  0xac   :  { %1020 = vrot.lane.b32.xlu1 %v2607_v30, %s1689_s16  ;;  %1018 = vrot.lane.b32.xlu0 %v2611_v31, %s1689_s16  ;;  %v4638_v31 = vld [vmem:[#allocation93_spill] sm:$0xff]  ;;  %v685_v41 = vadd.f32 %v557_v20, %v556_v18  ;;  %v694_v12 = vadd.f32 %v561_v15, %v560_v54  ;;  %v2885_v50 = vadd.f32 %v632_v48, %v2757_v62  ;;  %v607_v40 = vrot.slane %v2861_v57, 4  ;;  %v4642_v15 = vld [vmem:[#allocation24_spill] sm:$0xff] }
  0xad   :  { %v2858_v26 = vmul.f32 %v2481_v36, %v4638_v31  ;;  %v598_v31 = vrot.slane %v2846_v0, 4  ;;  %v641_v35 = vadd.f32 %v640_v16, %v2769_v6  ;;  %v650_v23 = vadd.f32 %v649_v38, %v2785_v37  ;;  %v4640_v6 = vld [vmem:[#allocation7_spill] sm:$0xff]  ;;  %v4641_v37 = vld [vmem:[#allocation8_spill] sm:$0xff] }
  0xae   :  { %v659_v32 = vadd.f32 %v658_v8, %v546_v5  ;;  %v668_v34 = vadd.f32 %v667_v55, %v550_v3  ;;  %v677_v39 = vadd.f32 %v676_v21, %v554_v60  ;;  %v686_v11 = vadd.f32 %v685_v41, %v558_v58 }
  0xaf   :  { %v695_v56 = vadd.f32 %v694_v12, %v562_v61  ;;  %v642_v62 = vadd.f32 %v641_v35, %v2773_v14  ;;  %v651_v53 = vadd.f32 %v650_v23, %v4639_v4  ;;  %v703_v60 = vadd.f32 %v565_v1, %v564_v19  ;;  %v4643_v14 = vld [vmem:[#allocation99_spill] sm:$0xff]  ;;  %v4644_v23 = vld [vmem:[#allocation25_spill] sm:$0xff] }
  0xb0   :  { %1024 = vrot.lane.b32.xlu1 %v2615_v49, %s1689_s16  ;;  %1022 = vrot.lane.b32.xlu0 %v2619_v13, %s1689_s16  ;;  %v660_v44 = vadd.f32 %v659_v32, %v4640_v6  ;;  %v669_v43 = vadd.f32 %v668_v34, %v4641_v37  ;;  %v678_v5 = vadd.f32 %v677_v39, %v555_v17  ;;  %v616_v61 = vrot.slane %v2864_v51, 4  ;;  %v4645_v32 = vld [vmem:[#allocation100_spill] sm:$0xff] }
  0xb1   :  { %v687_v63 = vadd.f32 %v686_v11, %v559_v52  ;;  %v696_v25 = vadd.f32 %v695_v56, %v563_v29  ;;  %v643_v3 = vrot.slane %v642_v62, 4  ;;  %v652_v22 = vrot.slane %v651_v53, 4 }
  0xb2   :  { %v661_v45 = vrot.slane %v660_v44, 4  ;;  %v670_v18 = vrot.slane %v669_v43, 4  ;;  %v679_v20 = vrot.slane %v678_v5, 4  ;;  %v704_v55 = vadd.f32 %v703_v60, %v566_v59 }
  0xb3   :  { %v688_v58 = vrot.slane %v687_v63, 4  ;;  %v697_v54 = vrot.slane %v696_v25, 4  ;;  %v644_v33 = vadd.f32 %v643_v3, %v642_v62  ;;  %v653_v17 = vadd.f32 %v652_v22, %v651_v53  ;;  %v4646_v22 = vld [vmem:[#allocation101_spill] sm:$0xff] }
  0xb4   :  { %1028 = vrot.lane.b32.xlu1 %v2627_v47, %s1689_s16  ;;  %1026 = vrot.lane.b32.xlu0 %v2631_v42, %s1689_s16  ;;  %v662_v52 = vadd.f32 %v661_v45, %v660_v44  ;;  %v671_v29 = vadd.f32 %v670_v18, %v669_v43  ;;  %v680_v48 = vadd.f32 %v679_v20, %v678_v5  ;;  %v625_v34 = vrot.slane %v2873_v2, 4  ;;  %v4647_v45 = vld [vmem:[#allocation102_spill] sm:$0xff] }
  0xb5   :  { %v689_v16 = vadd.f32 %v688_v58, %v687_v63  ;;  %v698_v38 = vadd.f32 %v697_v54, %v696_v25  ;;  %v645_v19 = vrot.slane %v644_v33, 2  ;;  %v654_v1 = vrot.slane %v653_v17, 2 }
  0xb6   :  { %v663_v8 = vrot.slane %v662_v52, 2  ;;  %v672_v21 = vrot.slane %v671_v29, 2  ;;  %v681_v41 = vrot.slane %v680_v48, 2  ;;  %v599_v59 = vadd.f32 %v598_v31, %v2846_v0 }
  0xb7   :  { %v690_v12 = vrot.slane %v689_v16, 2  ;;  %v699_v35 = vrot.slane %v698_v38, 2  ;;  %v646_v39 = vadd.f32 %v645_v19, %v644_v33  ;;  %v655_v11 = vadd.f32 %v654_v1, %v653_v17 }
  0xb8   :  { %1032 = vrot.lane.b32.xlu1 %v4642_v15, %s1689_s16  ;;  %1030 = vrot.lane.b32.xlu0 %v4643_v14, %s1689_s16  ;;  %v664_v56 = vadd.f32 %v663_v8, %v662_v52  ;;  %v673_v62 = vadd.f32 %v672_v21, %v671_v29  ;;  %v682_v4 = vadd.f32 %v681_v41, %v680_v48  ;;  %v573_v58 = vrot.slane %v2866_v24, 2  ;;  %v4649_v48 = vld [vmem:[#allocation103_spill] sm:$0xff] }
  0xb9   :  { %v691_v53 = vadd.f32 %v690_v12, %v689_v16  ;;  %v647_v6 = vrot.slane %v646_v39, 1  ;;  %v656_v44 = vrot.slane %v655_v11, 1  ;;  %v705_v43 = vadd.f32 %v704_v55, %v2858_v26  ;;  %v4650_v41 = vld [vmem:[#allocation31_spill] sm:$0xff] }
  0xba   :  { %v665_v37 = vrot.slane %v664_v56, 1  ;;  %v608_v5 = vadd.f32 %v607_v40, %v2861_v57  ;;  %v674_v63 = vrot.slane %v673_v62, 1  ;;  %v683_v25 = vrot.slane %v682_v4, 1 }
  0xbb   :  { %v700_v3 = vadd.f32 %v699_v35, %v698_v38  ;;  %v2915_v0 = vadd.f32 %v647_v6, %v646_v39  ;;  %v2917_v31 = vadd.f32 %v656_v44, %v655_v11  ;;  %v692_v60 = vrot.slane %v691_v53, 1 }
  0xbc   :  { %1036 = vrot.lane.b32.xlu1 %v4644_v23, %s1689_s16  ;;  %1034 = vrot.lane.b32.xlu0 %v4645_v32, %s1689_s16  ;;  %v706_v18 = vrot.slane %v705_v43, 4  ;;  %v617_v20 = vadd.f32 %v616_v61, %v2864_v51  ;;  %v626_v26 = vadd.f32 %v625_v34, %v2873_v2  ;;  %v634_v57 = vrot.slane %v2885_v50, 4  ;;  %v4648_v61 = vld [vmem:[#allocation30_spill] sm:$0xff] }
  0xbd   :  { %v2922_v40 = vadd.f32 %v665_v37, %v664_v56  ;;  %v2925_v54 = vadd.f32 %v674_v63, %v673_v62  ;;  %v742_v17 = vsel %vm728_vm14, %v2917_v31, %v2915_v0  ;;  %v582_v52 = vrot.slane %v2868_v46, 2 }
  0xbe   :  { %v707_v33 = vadd.f32 %v706_v18, %v705_v43  ;;  %v2931_v29 = vadd.f32 %v683_v25, %v682_v4  ;;  %v701_v51 = vrot.slane %v700_v3, 1  ;;  %v591_v16 = vrot.slane %v2870_v27, 2 }
  0xbf   :  { %v743_v2 = vsel %vm730_vm15, %v2922_v40, %v742_v17  ;;  %v2940_v38 = vadd.f32 %v692_v60, %v691_v53  ;;  %v600_v8 = vrot.slane %v599_v59, 2  ;;  %v635_v55 = vadd.f32 %v634_v57, %v2885_v50  ;;  %v4651_v50 = vld [vmem:[#allocation104_spill] sm:$0xff]  ;;  %v4652_v53 = vld [vmem:[#allocation105_spill] sm:$0xff] }
  0xc0   :  { %1040 = vrot.lane.b32.xlu1 %v4646_v22, %s1689_s16  ;;  %1038 = vrot.lane.b32.xlu0 %v4647_v45, %s1689_s16  ;;  %v708_v19 = vrot.slane %v707_v33, 2  ;;  %v744_v1 = vsel %vm732_vm0, %v2925_v54, %v743_v2  ;;  %v2949_v12 = vmul.f32 %v2485_v9, %v4650_v41  ;;  %v609_v35 = vrot.slane %v608_v5, 2 }
  0xc1   :  { %v745_v21 = vsel %vm734_vm1, %v2931_v29, %v744_v1  ;;  %v574_v11 = vadd.f32 %v573_v58, %v2866_v24  ;;  %v583_v56 = vadd.f32 %v582_v52, %v2868_v46  ;;  %v618_v62 = vrot.slane %v617_v20, 2 }
  0xc2   :  { %v709_v34 = vadd.f32 %v708_v19, %v707_v33  ;;  %v746_v39 = vsel %vm736_vm2, %v2940_v38, %v745_v21  ;;  %v2955_v4 = vadd.f32 %v701_v51, %v700_v3  ;;  %v2963_v6 = vmul.f32 %v2483_v10, %v4650_v41 }
  0xc3   :  { %v592_v44 = vadd.f32 %v591_v16, %v2870_v27  ;;  %v627_v37 = vrot.slane %v626_v26, 2  ;;  %v601_v24 = vadd.f32 %v600_v8, %v599_v59  ;;  %v636_v63 = vrot.slane %v635_v55, 2 }
  0xc4   :  { %1044 = vrot.lane.b32.xlu1 %v4648_v61, %s1689_s16  ;;  %1042 = vrot.lane.b32.xlu0 %v4649_v48, %s1689_s16  ;;  %v710_v43 = vrot.slane %v709_v34, 1  ;;  %v747_v46 = vsel %vm738_vm3, %v2955_v4, %v746_v39  ;;  %v610_v25 = vadd.f32 %v609_v35, %v608_v5  ;;  %v2972_v60 = vmul.f32 %v2481_v36, %v4650_v41 }
  0xc5   :  { %v575_v18 = vrot.slane %v574_v11, 1  ;;  %v584_v57 = vrot.slane %v583_v56, 1  ;;  %v619_v58 = vadd.f32 %v618_v62, %v617_v20  ;;  %v2980_v27 = vmul.f32 %v2479_v7, %v4650_v41 }
  0xc6   :  { %v2968_v3 = vadd.f32 %v710_v43, %v709_v34  ;;  %v593_v59 = vrot.slane %v592_v44, 1  ;;  %v628_v5 = vadd.f32 %v627_v37, %v626_v26  ;;  %v602_v17 = vrot.slane %v601_v24, 1  ;;  %v4653_v26 = vld [vmem:[#allocation32_spill] sm:$0xff] }
  0xc7   :  { %v637_v52 = vadd.f32 %v636_v63, %v635_v55  ;;  %v611_v20 = vrot.slane %v610_v25, 1  ;;  %v576_v51 = vadd.f32 %v575_v18, %v574_v11  ;;  %v585_v2 = vadd.f32 %v584_v57, %v583_v56  ;;  %v3029_v18 = vld [vmem:[%s4248_s0 + $0x8] sm:$0xff] }
  0xc8   :  { %1048 = vrot.lane.b32.xlu1 %v4651_v50, %s1689_s16  ;;  %1046 = vrot.lane.b32.xlu0 %v4652_v53, %s1689_s16  ;;  %v748_v33 = vsel %vm740_vm4, %v2968_v3, %v747_v46  ;;  %v620_v16 = vrot.slane %v619_v58, 1  ;;  %v2993_v19 = vmul.f32 %v2485_v9, %v4653_v26  ;;  %v2997_v1 = vmul.f32 %v2483_v10, %v4653_v26  ;;  %v3023_v46 = vld [vmem:[%s4248_s0] sm:$0xff] }
  0xc9   :  { %752 = vst [vmem:[%s4250_s2 + $0x8] sm:$0xff] %v748_v33  ;;  %v594_v8 = vadd.f32 %v593_v59, %v592_v44  ;;  %v629_v55 = vrot.slane %v628_v5, 1  ;;  %v603_v21 = vadd.f32 %v602_v17, %v601_v24  ;;  %v638_v41 = vrot.slane %v637_v52, 1 }
  0xca   :  { %4654 = vst [vmem:[#allocation9_spill] sm:$0xff] %v2997_v1  ;;  %v729_v35 = vsel %vm728_vm14, %v585_v2, %v576_v51  ;;  %v612_v34 = vadd.f32 %v611_v20, %v610_v25  ;;  %v3003_v11 = vmul.f32 %v2481_v36, %v4653_v26  ;;  %v621_v56 = vadd.f32 %v620_v16, %v619_v58 }
  0xcb   :  { %v731_v39 = vsel %vm730_vm15, %v594_v8, %v729_v35  ;;  %v3012_v44 = vmul.f32 %v2479_v7, %v4653_v26  ;;  %v3014_v37 = vadd.f32 %v629_v55, %v628_v5  ;;  %v3017_v24 = vadd.f32 %v638_v41, %v637_v52  ;;  %v4656_v5 = vld [vmem:[#allocation33_spill] sm:$0xff] }
  0xcc   :  { %1052 = vrot.lane.b32.xlu1 %v2949_v12, %s1689_s16  ;;  %1050 = vrot.lane.b32.xlu0 %v2963_v6, %s1689_s16  ;;  %v733_v62 = vsel %vm732_vm0, %v603_v21, %v731_v39  ;;  %v753_v25 = vrot.slane %v3023_v46, 1  ;;  %v760_v57 = vrot.slane %v3029_v18, 1  ;;  %v3042_v33 = vmul.f32 %v2485_v9, %v4656_v5 }
  0xcd   :  { %4655 = vst [vmem:[#allocation10_spill] sm:$0xff] %v3012_v44  ;;  %v735_v43 = vsel %vm734_vm1, %v612_v34, %v733_v62  ;;  %v3046_v17 = vmul.f32 %v2483_v10, %v4656_v5  ;;  %v754_v52 = vrot.slane %v3023_v46, 2  ;;  %v761_v20 = vrot.slane %v3029_v18, 2 }
  0xce   :  { %v737_v63 = vsel %vm736_vm2, %v621_v56, %v735_v43  ;;  %v784_v16 = vsub.f32 %v585_v2, %v753_v25  ;;  %v792_v26 = vsub.f32 %v2917_v31, %v760_v57  ;;  %v3060_v55 = vmul.f32 %v2481_v36, %v4656_v5 }
  0xcf   :  { %v739_v58 = vsel %vm738_vm3, %v3014_v37, %v737_v63  ;;  %4657 = vst [vmem:[#allocation11_spill] sm:$0xff] %v3046_v17  ;;  %v3064_v41 = vmul.f32 %v2479_v7, %v4656_v5  ;;  %v755_v35 = vrot.slane %v3023_v46, 3  ;;  %v762_v2 = vrot.slane %v3029_v18, 3 }
  0xd0   :  { %1056 = vrot.lane.b32.xlu1 %v2972_v60, %s1689_s16  ;;  %1054 = vrot.lane.b32.xlu0 %v2980_v27, %s1689_s16  ;;  %v741_v59 = vsel %vm740_vm4, %v3017_v24, %v739_v58  ;;  %v785_v39 = vsub.f32 %v594_v8, %v754_v52  ;;  %v793_v31 = vsub.f32 %v2922_v40, %v761_v20  ;;  %v756_v57 = vrot.slane %v3023_v46, 4  ;;  %v4659_v8 = vld [vmem:[#allocation38_spill] sm:$0xff] }
  0xd1   :  { %751 = vst [vmem:[%s4250_s2] sm:$0xff] %v741_v59  ;;  %4658 = vst [vmem:[#allocation12_spill] sm:$0xff] %v3064_v41  ;;  %v783_v62 = vsub.f32 %v576_v51, %v3023_v46  ;;  %v791_v43 = vsub.f32 %v2915_v0, %v3029_v18  ;;  %v800_v63 = vmul.f32 %v784_v16, %v784_v16  ;;  %v763_v58 = vrot.slane %v3029_v18, 4  ;;  %s1690_s2 = smov 32  }
  0xd2   :  { %v808_v25 = vmul.f32 %v792_v26, %v792_v26  ;;  %v3080_v40 = vmul.f32 %v2485_v9, %v4659_v8  ;;  %v786_v51 = vsub.f32 %v603_v21, %v755_v35  ;;  %v794_v59 = vsub.f32 %v2925_v54, %v762_v2 }
  0xd3   :  { %v757_v0 = vrot.slane %v3023_v46, 5  ;;  %v764_v5 = vrot.slane %v3029_v18, 5  ;;  %v801_v52 = vmul.f32 %v785_v39, %v785_v39  ;;  %v809_v20 = vmul.f32 %v793_v31, %v793_v31 }
  0xd4   :  { %1060 = vrot.lane.b32.xlu1 %v2993_v19, %s1689_s16  ;;  %1058 = vrot.lane.b32.xlu0 %v2997_v1, %s1689_s16  ;;  %v799_v16 = vmul.f32 %v783_v62, %v783_v62  ;;  %v807_v26 = vmul.f32 %v791_v43, %v791_v43  ;;  %v787_v1 = vsub.f32 %v612_v34, %v756_v57  ;;  %v758_v2 = vrot.slane %v3023_v46, 6 }
  0xd5   :  { %v3090_v21 = vmul.f32 %v2481_v36, %v4659_v8  ;;  %v802_v54 = vmul.f32 %v786_v51, %v786_v51  ;;  %v810_v35 = vmul.f32 %v794_v59, %v794_v59  ;;  %v765_v39 = vrot.slane %v3029_v18, 6  ;;  %v4660_v51 = vld [vmem:[#allocation39_spill] sm:$0xff] }
  0xd6   :  { %v833_v31 = vrot.slane %v801_v52, 6  ;;  %v847_v62 = vrot.slane %v809_v20, 6  ;;  %v788_v43 = vsub.f32 %v621_v56, %v757_v0  ;;  %v796_v34 = vsub.f32 %v2940_v38, %v764_v5 }
  0xd7   :  { %v803_v57 = vmul.f32 %v787_v1, %v787_v1  ;;  %v3102_v59 = vmul.f32 %v2485_v9, %v4660_v51  ;;  %v766_v52 = vrot.slane %v3029_v18, 7  ;;  %v835_v56 = vrot.slane %v802_v54, 5 }
  0xd8   :  { %1064 = vrot.lane.b32.xlu1 %v3003_v11, %s1689_s16  ;;  %1062 = vrot.lane.b32.xlu0 %v3012_v44, %s1689_s16  ;;  %v845_v44 = vrot.slane %v808_v25, 7  ;;  %v759_v25 = vrot.slane %v3023_v46, 7  ;;  %v849_v0 = vrot.slane %v810_v35, 5  ;;  %v789_v38 = vsub.f32 %v3014_v37, %v758_v2 }
  0xd9   :  { %v804_v46 = vmul.f32 %v788_v43, %v788_v43  ;;  %v3111_v5 = vmul.f32 %v2481_v36, %v4660_v51  ;;  %v837_v20 = vrot.slane %v803_v57, 4  ;;  %v798_v37 = vsub.f32 %v2968_v3, %v766_v52  ;;  %v4661_v43 = vld [vmem:[#allocation40_spill] sm:$0xff] }
  0xda   :  { %v790_v18 = vsub.f32 %v3017_v24, %v759_v25  ;;  %v805_v54 = vmul.f32 %v789_v38, %v789_v38  ;;  %v3125_v24 = vmul.f32 %v2485_v9, %v4661_v43 }
  0xdb   :  { %v839_v2 = vrot.slane %v804_v46, 3  ;;  %v4662_v46 = vld [vmem:[#allocation41_spill] sm:$0xff] }
  0xdc   :  { %1068 = vrot.lane.b32.xlu1 %v3042_v33, %s1689_s16  ;;  %1066 = vrot.lane.b32.xlu0 %v3046_v17, %s1689_s16  ;;  %v831_v17 = vrot.slane %v800_v63, 7  ;;  %v846_v63 = vsel %vm728_vm14, %v845_v44, %v807_v26  ;;  %v806_v3 = vmul.f32 %v790_v18, %v790_v18 }
  0xdd   :  { %v848_v1 = vsel %vm730_vm15, %v847_v62, %v846_v63 }
  0xde   :  { %v850_v26 = vsel %vm732_vm0, %v849_v0, %v848_v1  ;;  %v843_v0 = vrot.slane %v806_v3, 1 }
  0xe0   :  { %1072 = vrot.lane.b32.xlu1 %v3060_v55, %s1689_s16  ;;  %1070 = vrot.lane.b32.xlu0 %v3064_v41, %s1689_s16  ;;  %v795_v41 = vsub.f32 %v2931_v29, %v763_v58  ;;  %v832_v29 = vsel %vm728_vm14, %v831_v17, %v799_v16  ;;  %v797_v17 = vsub.f32 %v2955_v4, %v765_v39 }
  0xe1   :  { %v834_v44 = vsel %vm730_vm15, %v833_v31, %v832_v29  ;;  %v841_v29 = vrot.slane %v805_v54, 2 }
  0xe2   :  { %v811_v58 = vmul.f32 %v795_v41, %v795_v41  ;;  %v812_v41 = vmul.f32 %v796_v34, %v796_v34  ;;  %v836_v4 = vsel %vm732_vm0, %v835_v56, %v834_v44  ;;  %v813_v35 = vmul.f32 %v797_v17, %v797_v17 }
  0xe3   :  { %v838_v31 = vsel %vm734_vm1, %v837_v20, %v836_v4  ;;  %v814_v34 = vmul.f32 %v798_v37, %v798_v37  ;;  %v3133_v56 = vmul.f32 %v2481_v36, %v4661_v43 }
  0xe4   :  { %1076 = vrot.lane.b32.xlu1 %v3080_v40, %s1689_s16  ;;  %v851_v16 = vrot.slane %v811_v58, 4  ;;  %v853_v39 = vrot.slane %v812_v41, 3  ;;  %v855_v63 = vrot.slane %v813_v35, 2  ;;  %v840_v57 = vsel %vm736_vm2, %v839_v2, %v838_v31 }
  0xe5   :  { %v857_v38 = vrot.slane %v814_v34, 1  ;;  %v842_v17 = vsel %vm738_vm3, %v841_v29, %v840_v57  ;;  %v3141_v41 = vmul.f32 %v2485_v9, %v4662_v46 }
  0xe6   :  { %v852_v62 = vsel %vm734_vm1, %v851_v16, %v850_v26  ;;  %v844_v20 = vsel %vm740_vm4, %v843_v0, %v842_v17  ;;  %v3151_v26 = vmul.f32 %v2481_v36, %v4662_v46  ;;  %v4665_v0 = vld [vmem:[#allocation73_spill] sm:$0xff] }
  0xe7   :  { %v854_v58 = vsel %vm736_vm2, %v853_v39, %v852_v62 }
  0xe8   :  { %1080 = vrot.lane.b32.xlu1 %v3090_v21, %s1689_s16  ;;  %v856_v44 = vsel %vm738_vm3, %v855_v63, %v854_v58 }
  0xe9   :  { %v858_v16 = vsel %vm740_vm4, %v857_v38, %v856_v44  ;;  %v4667_v44 = vld [vmem:[#allocation78_spill] sm:$0xff] }
  0xea   :  { %v861_v4 = vadd.f32 %v858_v16, %v844_v20 }
  0xec   :  { %1084 = vrot.lane.b32.xlu1 %v3102_v59, %s1689_s16 }
  0xf0   :  { %1088 = vrot.lane.b32.xlu1 %v3111_v5, %s1689_s16 }
  0xf2   :  { %v1666_v25 = vpop.permute.xlu1 %1665  ;;  %v1661_v52 = vpop.permute.xlu0 %1660 }
  0xf3   :  { %v3158_v39 = vadd.low.f32.bf16 %v2483_v10, %v1661_v52  ;;  %v3165_v3 = vadd.high.f32.bf16 %v2485_v9, %v1661_v52  ;;  %v3170_v34 = vadd.low.f32.bf16 %v2479_v7, %v1666_v25  ;;  %v3177_v57 = vadd.high.f32.bf16 %v2481_v36, %v1666_v25 }
  0xf4   :  { %1092 = vrot.lane.b32.xlu1 %v3125_v24, %s1689_s16  ;;  %v3186_v9 = vmul.f32 %v2483_v10, %v4659_v8  ;;  %v3199_v36 = vmul.f32 %v2479_v7, %v4659_v8 }
  0xf5   :  { %4663 = vst [vmem:[#allocation13_spill] sm:$0xff] %v3170_v34  ;;  %4664 = vst [vmem:[#allocation18_spill] sm:$0xff] %v3177_v57 }
  0xf6   :  { %v981_v1 = vpop.permute.xlu1 %980  ;;  %v3145_v18 = vpop.permute.xlu0 %978 }
  0xf7   :  { %v3180_v38 = vadd.f32 %v981_v1, %v4665_v0  ;;  %v4669_v1 = vld [vmem:[#allocation83_spill] sm:$0xff] }
  0xf8   :  { %1096 = vrot.lane.b32.xlu1 %v3133_v56, %s1689_s16 }
  0xf9   :  { %4666 = vst [vmem:[#allocation19_spill] sm:$0xff] %v3180_v38 }
  0xfa   :  { %v985_v37 = vpop.permute.xlu1 %984  ;;  %v3153_v35 = vpop.permute.xlu0 %982 }
  0xfb   :  { %v3191_v20 = vadd.f32 %v985_v37, %v4667_v44  ;;  %v3212_v37 = vmul.f32 %v2483_v10, %v4660_v51  ;;  %v4672_v44 = vld [vmem:[#allocation89_spill] sm:$0xff] }
  0xfc   :  { %1100 = vrot.lane.b32.xlu1 %v3141_v41, %s1689_s16 }
  0xfd   :  { %4668 = vst [vmem:[#allocation20_spill] sm:$0xff] %v3191_v20  ;;  %4671 = vst [vmem:[#allocation26_spill] sm:$0xff] %v3212_v37 }
  0xfe   :  { %v989_v54 = vpop.permute.xlu1 %988  ;;  %v3162_v31 = vpop.permute.xlu0 %986 }
  0xff   :  { %862 = vadd.xlane.f32.xlu0 %v861_v4  ;;  %v3202_v16 = vadd.f32 %v989_v54, %v4669_v1  ;;  %v3223_v54 = vmul.f32 %v2479_v7, %v4660_v51 }
 0x100   :  { %1104 = vrot.lane.b32.xlu1 %v3151_v26, %s1689_s16 }
 0x101   :  { %4670 = vst [vmem:[#allocation21_spill] sm:$0xff] %v3202_v16  ;;  %4674 = vst [vmem:[#allocation28_spill] sm:$0xff] %v3223_v54 }
 0x102   :  { %v993_v2 = vpop.permute.xlu1 %992  ;;  %v3172_v63 = vpop.permute.xlu0 %990 }
 0x103   :  { %v3215_v8 = vadd.f32 %v993_v2, %v4672_v44  ;;  %v3236_v2 = vmul.f32 %v2483_v10, %v4661_v43 }
 0x104   :  { %885 = vrot.lane.b32.xlu1 %v3158_v39, %s1690_s2 }
 0x105   :  { %4673 = vst [vmem:[#allocation27_spill] sm:$0xff] %v3215_v8  ;;  %4677 = vst [vmem:[#allocation34_spill] sm:$0xff] %v3236_v2 }
 0x106   :  { %v997_v62 = vpop.permute.xlu1 %996  ;;  %v3188_v52 = vpop.permute.xlu0 %994 }
 0x108   :  { %887 = vrot.lane.b32.xlu1 %v3165_v3, %s1690_s2 }
 0x10a   :  { %v1001_v29 = vpop.permute.xlu1 %1000  ;;  %v3204_v4 = vpop.permute.xlu0 %998 }
 0x10c   :  { %889 = vrot.lane.b32.xlu1 %v3170_v34, %s1690_s2 }
 0x10e   :  { %v1005_v58 = vpop.permute.xlu1 %1004  ;;  %v3225_v1 = vpop.permute.xlu0 %1002 }
 0x110   :  { %891 = vrot.lane.b32.xlu1 %v3177_v57, %s1690_s2 }
 0x112   :  { %v1009_v17 = vpop.permute.xlu1 %1008 }
 0x114   :  { %1172 = vrot.lane.b32.xlu1 %v3180_v38, %s1690_s2 }
 0x115   :  { %1074 = vrot.lane.b32.xlu0 %v3186_v9, %s1689_s16 }
 0x116   :  { %v1013_v25 = vpop.permute.xlu1 %1012 }
 0x118   :  { %1176 = vrot.lane.b32.xlu1 %v3191_v20, %s1690_s2  ;;  %v4675_v20 = vld [vmem:[#allocation94_spill] sm:$0xff] }
 0x119   :  { %1078 = vrot.lane.b32.xlu0 %v3199_v36, %s1689_s16  ;;  %v3228_v38 = vadd.f32 %v997_v62, %v4675_v20  ;;  %v3247_v62 = vmul.f32 %v2479_v7, %v4661_v43  ;;  %v3269_v43 = vmul.f32 %v2479_v7, %v4662_v46 }
 0x11a   :  { %v1017_v0 = vpop.permute.xlu1 %1016 }
 0x11b   :  { %4676 = vst [vmem:[#allocation29_spill] sm:$0xff] %v3228_v38 }
 0x11c   :  { %1180 = vrot.lane.b32.xlu1 %v3202_v16, %s1690_s2  ;;  %v4678_v16 = vld [vmem:[#allocation96_spill] sm:$0xff] }
 0x11d   :  { %1082 = vrot.lane.b32.xlu0 %v3212_v37, %s1689_s16  ;;  %v3239_v51 = vadd.f32 %v1001_v29, %v4678_v16  ;;  %v1007_v37 = vpop.permute.xlu0 %1006  ;;  %v3258_v29 = vmul.f32 %v2483_v10, %v4662_v46 }
 0x11e   :  { %v1021_v34 = vpop.permute.xlu1 %1020 }
 0x11f   :  { %4679 = vst [vmem:[#allocation35_spill] sm:$0xff] %v3239_v51  ;;  %4682 = vst [vmem:[#allocation37_spill] sm:$0xff] %v3258_v29 }
 0x120   :  { %1184 = vrot.lane.b32.xlu1 %v3215_v8, %s1690_s2  ;;  %v4680_v8 = vld [vmem:[#allocation5_spill] sm:$0xff] }
 0x121   :  { %1086 = vrot.lane.b32.xlu0 %v3223_v54, %s1689_s16  ;;  %v3250_v54 = vadd.f32 %v1005_v58, %v4680_v8  ;;  %v1011_v16 = vpop.permute.xlu0 %1010  ;;  %v4685_v8 = vld [vmem:[#allocation22_spill] sm:$0xff] }
 0x122   :  { %v1025_v44 = vpop.permute.xlu1 %1024 }
 0x123   :  { %4681 = vst [vmem:[#allocation36_spill] sm:$0xff] %v3250_v54 }
 0x124   :  { %1188 = vrot.lane.b32.xlu1 %v3228_v38, %s1690_s2 }
 0x125   :  { %1090 = vrot.lane.b32.xlu0 %v3236_v2, %s1689_s16  ;;  %v4683_v2 = vld [vmem:[#allocation15_spill] sm:$0xff]  ;;  %v1015_v10 = vpop.permute.xlu0 %1014 }
 0x126   :  { %v1029_v20 = vpop.permute.xlu1 %1028  ;;  %v3261_v57 = vadd.f32 %v1009_v17, %v4683_v2  ;;  %v4687_v2 = vld [vmem:[#allocation74_spill] sm:$0xff] }
 0x128   :  { %1192 = vrot.lane.b32.xlu1 %v3239_v51, %s1690_s2  ;;  %4684 = vst [vmem:[#allocation42_spill] sm:$0xff] %v3261_v57  ;;  %v3272_v51 = vadd.f32 %v1013_v25, %v4685_v8  ;;  %v4688_v25 = vld [vmem:[#allocation79_spill] sm:$0xff] }
 0x129   :  { %1094 = vrot.lane.b32.xlu0 %v3247_v62, %s1689_s16  ;;  %v1019_v7 = vpop.permute.xlu0 %1018  ;;  %v3291_v8 = vadd.f32 %v3153_v35, %v4688_v25  ;;  %v4692_v35 = vld [vmem:[#allocation90_spill] sm:$0xff]  ;;  %v3316_v25 = vadd.f32 %v1029_v20, %v2627_v47 }
 0x12a   :  { %v1033_v38 = vpop.permute.xlu1 %1032  ;;  %4686 = vst [vmem:[#allocation43_spill] sm:$0xff] %v3272_v51 }
 0x12c   :  { %1196 = vrot.lane.b32.xlu1 %v3250_v54, %s1690_s2  ;;  %v3280_v54 = vadd.f32 %v3145_v18, %v4687_v2  ;;  %v4690_v18 = vld [vmem:[#allocation84_spill] sm:$0xff]  ;;  %v3305_v2 = vadd.f32 %v1025_v44, %v2615_v49  ;;  %v4693_v44 = vld [vmem:[#allocation95_spill] sm:$0xff] }
 0x12d   :  { %1098 = vrot.lane.b32.xlu0 %v3258_v29, %s1689_s16  ;;  %v3283_v29 = vadd.f32 %v1017_v0, %v2599_v28  ;;  %v3302_v0 = vadd.f32 %v3162_v31, %v4690_v18  ;;  %v3324_v18 = vadd.f32 %v3188_v52, %v4693_v44 }
 0x12e   :  { %v1037_v58 = vpop.permute.xlu1 %1036  ;;  %4691 = vst [vmem:[#allocation45_spill] sm:$0xff] %v3305_v2 }
 0x130   :  { %1200 = vrot.lane.b32.xlu1 %v3261_v57, %s1690_s2  ;;  %v3294_v57 = vadd.f32 %v1021_v34, %v2607_v30  ;;  %v3313_v34 = vadd.f32 %v3172_v63, %v4692_v35  ;;  %v4695_v63 = vld [vmem:[#allocation97_spill] sm:$0xff] }
 0x131   :  { %1102 = vrot.lane.b32.xlu0 %v3269_v43, %s1689_s16  ;;  %v3335_v20 = vadd.f32 %v3204_v4, %v4695_v63 }
 0x132   :  { %v1041_v17 = vpop.permute.xlu1 %1040  ;;  %4689 = vst [vmem:[#allocation44_spill] sm:$0xff] %v3294_v57 }
 0x133   :  { %v3349_v44 = vadd.f32 %v1041_v17, %v4646_v22 }
 0x134   :  { %1204 = vrot.lane.b32.xlu1 %v3272_v51, %s1690_s2  ;;  %v1023_v51 = vpop.permute.xlu0 %1022 }
 0x135   :  { %1170 = vrot.lane.b32.xlu0 %v3280_v54, %s1690_s2 }
 0x136   :  { %v1045_v46 = vpop.permute.xlu1 %1044 }
 0x138   :  { %1208 = vrot.lane.b32.xlu1 %v3283_v29, %s1690_s2  ;;  %v1027_v49 = vpop.permute.xlu0 %1026 }
 0x139   :  { %1174 = vrot.lane.b32.xlu0 %v3291_v8, %s1690_s2 }
 0x13a   :  { %v1049_v28 = vpop.permute.xlu1 %1048 }
 0x13c   :  { %1212 = vrot.lane.b32.xlu1 %v3294_v57, %s1690_s2  ;;  %v3327_v57 = vadd.f32 %v1033_v38, %v4642_v15  ;;  %v1031_v35 = vpop.permute.xlu0 %1030  ;;  %v4697_v38 = vld [vmem:[#allocation14_spill] sm:$0xff] }
 0x13d   :  { %1178 = vrot.lane.b32.xlu0 %v3302_v0, %s1690_s2  ;;  %v3346_v52 = vadd.f32 %v3225_v1, %v4697_v38  ;;  %v4700_v1 = vld [vmem:[#allocation17_spill] sm:$0xff] }
 0x13e   :  { %v1053_v30 = vpop.permute.xlu1 %1052  ;;  %4694 = vst [vmem:[#allocation46_spill] sm:$0xff] %v3327_v57  ;;  %v3366_v17 = vadd.f32 %v1011_v16, %v4700_v1 }
 0x140   :  { %1216 = vrot.lane.b32.xlu1 %v3305_v2, %s1690_s2  ;;  %v3338_v2 = vadd.f32 %v1037_v58, %v4644_v23  ;;  %v1035_v23 = vpop.permute.xlu0 %1034  ;;  %v4698_v58 = vld [vmem:[#allocation16_spill] sm:$0xff] }
 0x141   :  { %1182 = vrot.lane.b32.xlu0 %v3313_v34, %s1690_s2  ;;  %v3356_v63 = vadd.f32 %v1007_v37, %v4698_v58  ;;  %v4701_v37 = vld [vmem:[#allocation98_spill] sm:$0xff]  ;;  %v3379_v58 = vadd.f32 %v1053_v30, %v2949_v12 }
 0x142   :  { %v1057_v31 = vpop.permute.xlu1 %1056  ;;  %4696 = vst [vmem:[#allocation47_spill] sm:$0xff] %v3338_v2 }
 0x144   :  { %1220 = vrot.lane.b32.xlu1 %v3316_v25, %s1690_s2  ;;  %v1039_v38 = vpop.permute.xlu0 %1038 }
 0x145   :  { %1186 = vrot.lane.b32.xlu0 %v3324_v18, %s1690_s2 }
 0x146   :  { %v1061_v47 = vpop.permute.xlu1 %1060 }
 0x148   :  { %1224 = vrot.lane.b32.xlu1 %v3327_v57, %s1690_s2  ;;  %v3359_v57 = vadd.f32 %v1045_v46, %v4648_v61  ;;  %v3376_v46 = vadd.f32 %v1015_v10, %v4701_v37  ;;  %v3396_v10 = vadd.f32 %v1023_v51, %v2619_v13  ;;  %v3399_v37 = vadd.f32 %v1061_v47, %v2993_v19 }
 0x149   :  { %1190 = vrot.lane.b32.xlu0 %v3335_v20, %s1690_s2  ;;  %v3416_v51 = vadd.f32 %v1031_v35, %v4643_v14 }
 0x14a   :  { %v1065_v15 = vpop.permute.xlu1 %1064  ;;  %4699 = vst [vmem:[#allocation48_spill] sm:$0xff] %v3359_v57 }
 0x14c   :  { %1228 = vrot.lane.b32.xlu1 %v3338_v2, %s1690_s2  ;;  %v3369_v2 = vadd.f32 %v1049_v28, %v4651_v50  ;;  %v1043_v50 = vpop.permute.xlu0 %1042  ;;  %v4702_v28 = vld [vmem:[#allocation23_spill] sm:$0xff] }
 0x14d   :  { %1194 = vrot.lane.b32.xlu0 %v3346_v52, %s1690_s2  ;;  %v3386_v1 = vadd.f32 %v1019_v7, %v4702_v28  ;;  %v3406_v7 = vadd.f32 %v1027_v49, %v2631_v42 }
 0x14e   :  { %v1069_v4 = vpop.permute.xlu1 %1068 }
 0x14f   :  { %v3419_v47 = vadd.f32 %v1069_v4, %v3042_v33  ;;  %v3436_v33 = vadd.f32 %v1039_v38, %v4647_v45 }
 0x150   :  { %1232 = vrot.lane.b32.xlu1 %v3349_v44, %s1690_s2  ;;  %v1047_v30 = vpop.permute.xlu0 %1046 }
 0x151   :  { %1198 = vrot.lane.b32.xlu0 %v3356_v63, %s1690_s2 }
 0x152   :  { %v1073_v22 = vpop.permute.xlu1 %1072 }
 0x154   :  { %1236 = vrot.lane.b32.xlu1 %v3359_v57, %s1690_s2  ;;  %v3389_v57 = vadd.f32 %v1057_v31, %v2972_v60  ;;  %v3409_v31 = vadd.f32 %v1065_v15, %v3003_v11  ;;  %v1051_v13 = vpop.permute.xlu0 %1050  ;;  %v3426_v11 = vadd.f32 %v1035_v23, %v4645_v32  ;;  %v3429_v15 = vadd.f32 %v1073_v22, %v3060_v55 }
 0x155   :  { %1202 = vrot.lane.b32.xlu0 %v3366_v17, %s1690_s2  ;;  %v3446_v23 = vadd.f32 %v1043_v50, %v4649_v48 }
 0x156   :  { %v1077_v61 = vpop.permute.xlu1 %1076 }
 0x157   :  { %v3439_v35 = vadd.f32 %v1077_v61, %v3080_v40  ;;  %v3456_v40 = vadd.f32 %v1047_v30, %v4652_v53 }
 0x158   :  { %1240 = vrot.lane.b32.xlu1 %v3369_v2, %s1690_s2  ;;  %v1055_v49 = vpop.permute.xlu0 %1054 }
 0x159   :  { %1206 = vrot.lane.b32.xlu0 %v3376_v46, %s1690_s2  ;;  %v3478_v50 = vadd.f32 %v1055_v49, %v2980_v27 }
 0x15a   :  { %v1081_v16 = vpop.permute.xlu1 %1080 }
 0x15b   :  { %v3449_v4 = vadd.f32 %v1081_v16, %v3090_v21  ;;  %v3466_v21 = vadd.f32 %v1051_v13, %v2963_v6 }
 0x15c   :  { %1244 = vrot.lane.b32.xlu1 %v3379_v58, %s1690_s2  ;;  %v1059_v32 = vpop.permute.xlu0 %1058 }
 0x15d   :  { %1210 = vrot.lane.b32.xlu0 %v3386_v1, %s1690_s2 }
 0x15e   :  { %v1085_v12 = vpop.permute.xlu1 %1084 }
 0x15f   :  { %v3459_v38 = vadd.f32 %v1085_v12, %v3102_v59 }
 0x160   :  { %1248 = vrot.lane.b32.xlu1 %v3389_v57, %s1690_s2  ;;  %v1063_v22 = vpop.permute.xlu0 %1062 }
 0x161   :  { %1214 = vrot.lane.b32.xlu0 %v3396_v10, %s1690_s2 }
 0x162   :  { %v1089_v60 = vpop.permute.xlu1 %1088 }
 0x163   :  { %v3469_v61 = vadd.f32 %v1089_v60, %v3111_v5  ;;  %v4704_v5 = vld [vmem:[#allocation9_spill] sm:$0xff] }
 0x164   :  { %1252 = vrot.lane.b32.xlu1 %v3399_v37, %s1690_s2  ;;  %v1067_v53 = vpop.permute.xlu0 %1066  ;;  %v3488_v28 = vadd.f32 %v1059_v32, %v4704_v5 }
 0x165   :  { %1218 = vrot.lane.b32.xlu0 %v3406_v7, %s1690_s2 }
 0x166   :  { %v1093_v19 = vpop.permute.xlu1 %1092 }
 0x167   :  { %v3481_v16 = vadd.f32 %v1093_v19, %v3125_v24  ;;  %v4706_v24 = vld [vmem:[#allocation10_spill] sm:$0xff] }
 0x168   :  { %1256 = vrot.lane.b32.xlu1 %v3409_v31, %s1690_s2  ;;  %v1071_v12 = vpop.permute.xlu0 %1070  ;;  %v3498_v60 = vadd.f32 %v1063_v22, %v4706_v24  ;;  %v4710_v24 = vld [vmem:[#allocation12_spill] sm:$0xff] }
 0x169   :  { %1222 = vrot.lane.b32.xlu0 %v3416_v51, %s1690_s2  ;;  %4703 = vst [vmem:[#allocation49_spill] sm:$0xff] %v3481_v16 }
 0x16a   :  { %v1097_v42 = vpop.permute.xlu1 %1096  ;;  %4707 = vst [vmem:[#allocation51_spill] sm:$0xff] %v3498_v60 }
 0x16b   :  { %v3491_v30 = vadd.f32 %v1097_v42, %v3133_v56  ;;  %v4708_v42 = vld [vmem:[#allocation11_spill] sm:$0xff] }
 0x16c   :  { %1260 = vrot.lane.b32.xlu1 %v3419_v47, %s1690_s2  ;;  %v3508_v32 = vadd.f32 %v1067_v53, %v4708_v42 }
 0x16d   :  { %1226 = vrot.lane.b32.xlu0 %v3426_v11, %s1690_s2  ;;  %4705 = vst [vmem:[#allocation50_spill] sm:$0xff] %v3491_v30 }
 0x16e   :  { %v1101_v14 = vpop.permute.xlu1 %1100 }
 0x16f   :  { %v3501_v13 = vadd.f32 %v1101_v14, %v3141_v41 }
 0x170   :  { %1264 = vrot.lane.b32.xlu1 %v3429_v15, %s1690_s2 }
 0x171   :  { %1230 = vrot.lane.b32.xlu0 %v3436_v33, %s1690_s2 }
 0x172   :  { %v1105_v55 = vpop.permute.xlu1 %1104 }
 0x174   :  { %1268 = vrot.lane.b32.xlu1 %v3439_v35, %s1690_s2 }
 0x175   :  { %1234 = vrot.lane.b32.xlu0 %v3446_v23, %s1690_s2 }
 0x176   :  { %v886_v45 = vpop.permute.xlu1 %885 }
 0x178   :  { %1272 = vrot.lane.b32.xlu1 %v3449_v4, %s1690_s2 }
 0x179   :  { %1238 = vrot.lane.b32.xlu0 %v3456_v40, %s1690_s2 }
 0x17a   :  { %v888_v48 = vpop.permute.xlu1 %887 }
 0x17c   :  { %1276 = vrot.lane.b32.xlu1 %v3459_v38, %s1690_s2 }
 0x17d   :  { %1242 = vrot.lane.b32.xlu0 %v3466_v21, %s1690_s2 }
 0x17e   :  { %v3475_v59 = vpop.permute.xlu1 %889 }
 0x180   :  { %1280 = vrot.lane.b32.xlu1 %v3469_v61, %s1690_s2 }
 0x181   :  { %1246 = vrot.lane.b32.xlu0 %v3478_v50, %s1690_s2 }
 0x182   :  { %v892_v6 = vpop.permute.xlu1 %891 }
 0x184   :  { %1284 = vrot.lane.b32.xlu1 %v3481_v16, %s1690_s2  ;;  %v3511_v16 = vadd.f32 %v1105_v55, %v3151_v26  ;;  %v3525_v55 = vadd.f32 %v3158_v39, %v886_v45  ;;  %v4712_v45 = vld [vmem:[#allocation18_spill] sm:$0xff] }
 0x185   :  { %1250 = vrot.lane.b32.xlu0 %v3488_v28, %s1690_s2 }
 0x186   :  { %v1173_v27 = vpop.permute.xlu1 %1172  ;;  %4709 = vst [vmem:[#allocation52_spill] sm:$0xff] %v3511_v16 }
 0x188   :  { %1288 = vrot.lane.b32.xlu1 %v3491_v30, %s1690_s2  ;;  %v863_v19 = vpop.xlane.xlu0 %862  ;;  %v3518_v30 = vadd.f32 %v1071_v12, %v4710_v24  ;;  %v4713_v24 = vld [vmem:[#allocation26_spill] sm:$0xff] }
 0x189   :  { %v864_v49 = vrot.slane %v863_v19, 4  ;;  %1254 = vrot.lane.b32.xlu0 %v3498_v60, %s1690_s2 }
 0x18a   :  { %v1177_v56 = vpop.permute.xlu1 %1176 }
 0x18b   :  { %v865_v5 = vadd.f32 %v864_v49, %v863_v19 }
 0x18c   :  { %1292 = vrot.lane.b32.xlu1 %v3501_v13, %s1690_s2  ;;  %v1075_v41 = vpop.permute.xlu0 %1074 }
 0x18d   :  { %1258 = vrot.lane.b32.xlu0 %v3508_v32, %s1690_s2  ;;  %v866_v14 = vrot.slane %v865_v5, 2  ;;  %v3528_v49 = vadd.f32 %v1075_v41, %v3186_v9 }
 0x18e   :  { %v1181_v22 = vpop.permute.xlu1 %1180 }
 0x18f   :  { %v867_v60 = vadd.f32 %v866_v14, %v865_v5  ;;  %v3535_v5 = vadd.f32 %v3165_v3, %v888_v48 }
 0x190   :  { %1296 = vrot.lane.b32.xlu1 %v3511_v16, %s1690_s2  ;;  %v1079_v53 = vpop.permute.xlu0 %1078  ;;  %v4720_v16 = vld [vmem:[#allocation34_spill] sm:$0xff] }
 0x191   :  { %1262 = vrot.lane.b32.xlu0 %v3518_v30, %s1690_s2  ;;  %v868_v26 = vrot.slane %v867_v60, 1  ;;  %v3538_v39 = vadd.f32 %v1079_v53, %v3199_v36  ;;  %v4715_v36 = vld [vmem:[#allocation19_spill] sm:$0xff] }
 0x192   :  { %v1185_v19 = vpop.permute.xlu1 %1184  ;;  %v3555_v48 = vadd.f32 %v1173_v27, %v4715_v36 }
 0x193   :  { %v869_v42 = vadd.f32 %v868_v26, %v867_v60  ;;  %4711 = vst [vmem:[#allocation53_spill] sm:$0xff] %v3538_v39  ;;  %v3545_v60 = vadd.f32 %v4712_v45, %v892_v6 }
 0x194   :  { %897 = vrot.lane.b32.xlu1 %v3525_v55, %s1691_s23  ;;  %v1083_v12 = vpop.permute.xlu0 %1082 }
 0x195   :  { %1651 = vpush %v869_v42  ;;  %1266 = vrot.lane.b32.xlu0 %v3528_v49, %s1690_s2  ;;  %v3548_v26 = vadd.f32 %v1083_v12, %v4713_v24  ;;  %v4716_v42 = vld [vmem:[#allocation28_spill] sm:$0xff] }
 0x196   :  { %v1189_v14 = vpop.permute.xlu1 %1188  ;;  %v4718_v12 = vld [vmem:[#allocation20_spill] sm:$0xff] }
 0x197   :  { %4714 = vst [vmem:[#allocation54_spill] sm:$0xff] %v3548_v26  ;;  %v3565_v45 = vadd.f32 %v1177_v56, %v4718_v12 }
 0x198   :  { %899 = vrot.lane.b32.xlu1 %v3535_v5, %s1691_s23  ;;  %v1087_v9 = vpop.permute.xlu0 %1086 }
 0x199   :  { %1270 = vrot.lane.b32.xlu0 %v3538_v39, %s1690_s2  ;;  %v3558_v39 = vadd.f32 %v1087_v9, %v4716_v42  ;;  %4719 = vst [vmem:[#allocation56_spill] sm:$0xff] %v3565_v45  ;;  %v4722_v9 = vld [vmem:[#allocation21_spill] sm:$0xff] }
 0x19a   :  { %v1193_v41 = vpop.permute.xlu1 %1192  ;;  %v3575_v36 = vadd.f32 %v1181_v22, %v4722_v9 }
 0x19b   :  { %4717 = vst [vmem:[#allocation55_spill] sm:$0xff] %v3558_v39 }
 0x19c   :  { %903 = vrot.lane.b32.xlu1 %v3545_v60, %s1691_s23  ;;  %v1091_v3 = vpop.permute.xlu0 %1090 }
 0x19d   :  { %1274 = vrot.lane.b32.xlu0 %v3548_v26, %s1690_s2  ;;  %v3568_v26 = vadd.f32 %v1091_v3, %v4720_v16  ;;  %v4724_v16 = vld [vmem:[#allocation27_spill] sm:$0xff] }
 0x19e   :  { %v1197_v53 = vpop.permute.xlu1 %1196  ;;  %v3585_v3 = vadd.f32 %v1185_v19, %v4724_v16 }
 0x19f   :  { %4721 = vst [vmem:[#allocation57_spill] sm:$0xff] %v3568_v26 }
 0x1a0   :  { %1364 = vrot.lane.b32.xlu1 %v3555_v48, %s1691_s23  ;;  %v1095_v6 = vpop.permute.xlu0 %1094  ;;  %4725 = vst [vmem:[#allocation59_spill] sm:$0xff] %v3585_v3 }
 0x1a1   :  { %1278 = vrot.lane.b32.xlu0 %v3558_v39, %s1690_s2  ;;  %v3578_v39 = vadd.f32 %v1095_v6, %v3247_v62  ;;  %v4728_v62 = vld [vmem:[#allocation29_spill] sm:$0xff] }
 0x1a2   :  { %v1201_v24 = vpop.permute.xlu1 %1200  ;;  %v3595_v6 = vadd.f32 %v1189_v14, %v4728_v62  ;;  %v4733_v14 = vld [vmem:[#allocation36_spill] sm:$0xff] }
 0x1a3   :  { %4723 = vst [vmem:[#allocation58_spill] sm:$0xff] %v3578_v39 }
 0x1a4   :  { %1368 = vrot.lane.b32.xlu1 %v3565_v45, %s1691_s23  ;;  %v1099_v27 = vpop.permute.xlu0 %1098  ;;  %v4726_v45 = vld [vmem:[#allocation37_spill] sm:$0xff] }
 0x1a5   :  { %1282 = vrot.lane.b32.xlu0 %v3568_v26, %s1690_s2  ;;  %v3588_v26 = vadd.f32 %v1099_v27, %v4726_v45  ;;  %v4730_v45 = vld [vmem:[#allocation35_spill] sm:$0xff] }
 0x1a6   :  { %v1205_v42 = vpop.permute.xlu1 %1204  ;;  %v3605_v27 = vadd.f32 %v1193_v41, %v4730_v45 }
 0x1a7   :  { %4727 = vst [vmem:[#allocation60_spill] sm:$0xff] %v3588_v26 }
 0x1a8   :  { %1372 = vrot.lane.b32.xlu1 %v3575_v36, %s1691_s23  ;;  %v1103_v56 = vpop.permute.xlu0 %1102 }
 0x1a9   :  { %1286 = vrot.lane.b32.xlu0 %v3578_v39, %s1690_s2  ;;  %v3598_v39 = vadd.f32 %v1103_v56, %v3269_v43  ;;  %v3616_v56 = vadd.f32 %v1197_v53, %v4733_v14 }
 0x1aa   :  { %v1209_v12 = vpop.permute.xlu1 %1208 }
 0x1ab   :  { %4729 = vst [vmem:[#allocation61_spill] sm:$0xff] %v3598_v39 }
 0x1ac   :  { %1376 = vrot.lane.b32.xlu1 %v3585_v3, %s1691_s23  ;;  %v1171_v22 = vpop.permute.xlu0 %1170 }
 0x1ad   :  { %1290 = vrot.lane.b32.xlu0 %v3588_v26, %s1690_s2  ;;  %v4731_v26 = vld [vmem:[#allocation13_spill] sm:$0xff] }
 0x1ae   :  { %v1213_v9 = vpop.permute.xlu1 %1212  ;;  %v3609_v3 = vadd.f32 %v4731_v26, %v3475_v59  ;;  %v4735_v59 = vld [vmem:[#allocation42_spill] sm:$0xff] }
 0x1af   :  { %v3626_v26 = vadd.f32 %v1201_v24, %v4735_v59 }
 0x1b0   :  { %1380 = vrot.lane.b32.xlu1 %v3595_v6, %s1691_s23  ;;  %v1175_v19 = vpop.permute.xlu0 %1174  ;;  %4732 = vst [vmem:[#allocation62_spill] sm:$0xff] %v3609_v3 }
 0x1b1   :  { %1294 = vrot.lane.b32.xlu0 %v3598_v39, %s1690_s2  ;;  %v3619_v39 = vadd.f32 %v1171_v22, %v3280_v54  ;;  %v4736_v54 = vld [vmem:[#allocation43_spill] sm:$0xff] }
 0x1b2   :  { %v1217_v16 = vpop.permute.xlu1 %1216  ;;  %v3636_v22 = vadd.f32 %v1205_v42, %v4736_v54 }
 0x1b3   :  { %4734 = vst [vmem:[#allocation63_spill] sm:$0xff] %v3619_v39 }
 0x1b4   :  { %1384 = vrot.lane.b32.xlu1 %v3605_v27, %s1691_s23  ;;  %v1179_v43 = vpop.permute.xlu0 %1178 }
 0x1b5   :  { %901 = vrot.lane.b32.xlu0 %v3609_v3, %s1691_s23  ;;  %v3629_v3 = vadd.f32 %v1175_v19, %v3291_v8  ;;  %v3646_v8 = vadd.f32 %v1209_v12, %v3283_v29 }
 0x1b6   :  { %v1221_v62 = vpop.permute.xlu1 %1220 }
 0x1b8   :  { %1388 = vrot.lane.b32.xlu1 %v3616_v56, %s1691_s23  ;;  %v1183_v41 = vpop.permute.xlu0 %1182 }
 0x1b9   :  { %1362 = vrot.lane.b32.xlu0 %v3619_v39, %s1691_s23  ;;  %v3639_v39 = vadd.f32 %v1179_v43, %v3302_v0  ;;  %v3649_v59 = vadd.f32 %v1183_v41, %v3313_v34  ;;  %v4738_v0 = vld [vmem:[#allocation44_spill] sm:$0xff]  ;;  %v4740_v34 = vld [vmem:[#allocation45_spill] sm:$0xff] }
 0x1ba   :  { %v1225_v45 = vpop.permute.xlu1 %1224  ;;  %v3656_v43 = vadd.f32 %v1213_v9, %v4738_v0  ;;  %v3666_v12 = vadd.f32 %v1217_v16, %v4740_v34 }
 0x1bb   :  { %4737 = vst [vmem:[#allocation64_spill] sm:$0xff] %v3639_v39 }
 0x1bc   :  { %1392 = vrot.lane.b32.xlu1 %v3626_v26, %s1691_s23  ;;  %v1187_v53 = vpop.permute.xlu0 %1186 }
 0x1bd   :  { %1366 = vrot.lane.b32.xlu0 %v3629_v3, %s1691_s23 }
 0x1be   :  { %v1229_v14 = vpop.permute.xlu1 %1228 }
 0x1c0   :  { %1396 = vrot.lane.b32.xlu1 %v3636_v22, %s1691_s23  ;;  %v1191_v24 = vpop.permute.xlu0 %1190 }
 0x1c1   :  { %1370 = vrot.lane.b32.xlu0 %v3639_v39, %s1691_s23  ;;  %v3659_v39 = vadd.f32 %v1187_v53, %v3324_v18  ;;  %v3669_v9 = vadd.f32 %v1191_v24, %v3335_v20  ;;  %v3676_v53 = vadd.f32 %v1221_v62, %v3316_v25  ;;  %v4743_v20 = vld [vmem:[#allocation46_spill] sm:$0xff] }
 0x1c2   :  { %v1233_v19 = vpop.permute.xlu1 %1232  ;;  %v3686_v24 = vadd.f32 %v1225_v45, %v4743_v20 }
 0x1c3   :  { %4739 = vst [vmem:[#allocation65_spill] sm:$0xff] %v3659_v39  ;;  %4741 = vst [vmem:[#allocation66_spill] sm:$0xff] %v3669_v9 }
 0x1c4   :  { %1400 = vrot.lane.b32.xlu1 %v3646_v8, %s1691_s23  ;;  %v1195_v42 = vpop.permute.xlu0 %1194 }
 0x1c5   :  { %1374 = vrot.lane.b32.xlu0 %v3649_v59, %s1691_s23 }
 0x1c6   :  { %v1237_v54 = vpop.permute.xlu1 %1236  ;;  %s1652_s24 = spop %1651 }
 0x1c7   :  { %872 = sst [smem:[#allocation2]] %s1652_s24 }
 0x1c8   :  { %1404 = vrot.lane.b32.xlu1 %v3656_v43, %s1691_s23  ;;  %v1199_v29 = vpop.permute.xlu0 %1198  ;;  %1633 = dma.smem_to_hbm %s1692_s21, 16, %s4254_s6, [#allocation3]  }
 0x1c9   :  { %1378 = vrot.lane.b32.xlu0 %v3659_v39, %s1691_s23  ;;  %v3679_v39 = vadd.f32 %v1195_v42, %v3346_v52  ;;  %v4744_v52 = vld [vmem:[#allocation47_spill] sm:$0xff] }
 0x1ca   :  { %v1241_v41 = vpop.permute.xlu1 %1240  ;;  %v3696_v62 = vadd.f32 %v1229_v14, %v4744_v52 }
 0x1cb   :  { %4742 = vst [vmem:[#allocation67_spill] sm:$0xff] %v3679_v39 }
 0x1cc   :  { %1408 = vrot.lane.b32.xlu1 %v3666_v12, %s1691_s23  ;;  %v1203_v18 = vpop.permute.xlu0 %1202 }
 0x1cd   :  { %1382 = vrot.lane.b32.xlu0 %v3669_v9, %s1691_s23  ;;  %v3689_v9 = vadd.f32 %v1199_v29, %v3356_v63  ;;  %v3706_v63 = vadd.f32 %v1233_v19, %v3349_v44 }
 0x1ce   :  { %v1245_v0 = vpop.permute.xlu1 %1244 }
 0x1d0   :  { %1412 = vrot.lane.b32.xlu1 %v3676_v53, %s1691_s23  ;;  %v1207_v16 = vpop.permute.xlu0 %1206 }
 0x1d1   :  { %1386 = vrot.lane.b32.xlu0 %v3679_v39, %s1691_s23  ;;  %v3699_v39 = vadd.f32 %v1203_v18, %v3366_v17  ;;  %v3709_v20 = vadd.f32 %v1207_v16, %v3376_v46  ;;  %v4746_v17 = vld [vmem:[#allocation48_spill] sm:$0xff]  ;;  %v3726_v46 = vadd.f32 %v1241_v41, %v3369_v2 }
 0x1d2   :  { %v1249_v34 = vpop.permute.xlu1 %1248  ;;  %v3716_v18 = vadd.f32 %v1237_v54, %v4746_v17 }
 0x1d3   :  { %4745 = vst [vmem:[#allocation68_spill] sm:$0xff] %v3699_v39 }
 0x1d4   :  { %1416 = vrot.lane.b32.xlu1 %v3686_v24, %s1691_s23  ;;  %v1211_v25 = vpop.permute.xlu0 %1210 }
 0x1d5   :  { %1390 = vrot.lane.b32.xlu0 %v3689_v9, %s1691_s23 }
 0x1d6   :  { %v1253_v42 = vpop.permute.xlu1 %1252 }
 0x1d8   :  { %1420 = vrot.lane.b32.xlu1 %v3696_v62, %s1691_s23  ;;  %v1215_v45 = vpop.permute.xlu0 %1214 }
 0x1d9   :  { %1394 = vrot.lane.b32.xlu0 %v3699_v39, %s1691_s23  ;;  %v3719_v39 = vadd.f32 %v1211_v25, %v3386_v1  ;;  %v3729_v16 = vadd.f32 %v1215_v45, %v3396_v10  ;;  %v3736_v1 = vadd.f32 %v1245_v0, %v3379_v58  ;;  %v3746_v10 = vadd.f32 %v1249_v34, %v3389_v57 }
 0x1da   :  { %v1257_v29 = vpop.permute.xlu1 %1256 }
 0x1dc   :  { %1424 = vrot.lane.b32.xlu1 %v3706_v63, %s1691_s23  ;;  %v1219_v14 = vpop.permute.xlu0 %1218 }
 0x1dd   :  { %1398 = vrot.lane.b32.xlu0 %v3709_v20, %s1691_s23  ;;  %v3739_v17 = vadd.f32 %v1219_v14, %v3406_v7  ;;  %v3756_v7 = vadd.f32 %v1253_v42, %v3399_v37 }
 0x1de   :  { %v1261_v52 = vpop.permute.xlu1 %1260 }
 0x1e0   :  { %1428 = vrot.lane.b32.xlu1 %v3716_v18, %s1691_s23  ;;  %v1223_v44 = vpop.permute.xlu0 %1222 }
 0x1e1   :  { %1402 = vrot.lane.b32.xlu0 %v3719_v39, %s1691_s23  ;;  %v3749_v45 = vadd.f32 %v1223_v44, %v3416_v51  ;;  %v3766_v51 = vadd.f32 %v1257_v29, %v3409_v31 }
 0x1e2   :  { %v1265_v19 = vpop.permute.xlu1 %1264 }
 0x1e4   :  { %1432 = vrot.lane.b32.xlu1 %v3726_v46, %s1691_s23  ;;  %v1227_v54 = vpop.permute.xlu0 %1226 }
 0x1e5   :  { %1406 = vrot.lane.b32.xlu0 %v3729_v16, %s1691_s23  ;;  %v3759_v14 = vadd.f32 %v1227_v54, %v3426_v11  ;;  %v3776_v11 = vadd.f32 %v1261_v52, %v3419_v47 }
 0x1e6   :  { %v1269_v25 = vpop.permute.xlu1 %1268 }
 0x1e8   :  { %1436 = vrot.lane.b32.xlu1 %v3736_v1, %s1691_s23  ;;  %v1231_v2 = vpop.permute.xlu0 %1230 }
 0x1e9   :  { %1410 = vrot.lane.b32.xlu0 %v3739_v17, %s1691_s23  ;;  %v3769_v44 = vadd.f32 %v1231_v2, %v3436_v33  ;;  %v3786_v33 = vadd.f32 %v1265_v19, %v3429_v15 }
 0x1ea   :  { %v1273_v41 = vpop.permute.xlu1 %1272 }
 0x1ec   :  { %1440 = vrot.lane.b32.xlu1 %v3746_v10, %s1691_s23  ;;  %v1235_v58 = vpop.permute.xlu0 %1234 }
 0x1ed   :  { %1414 = vrot.lane.b32.xlu0 %v3749_v45, %s1691_s23  ;;  %v3779_v54 = vadd.f32 %v1235_v58, %v3446_v23  ;;  %v3796_v23 = vadd.f32 %v1269_v25, %v3439_v35 }
 0x1ee   :  { %v1277_v0 = vpop.permute.xlu1 %1276 }
 0x1f0   :  { %1444 = vrot.lane.b32.xlu1 %v3756_v7, %s1691_s23  ;;  %v1239_v57 = vpop.permute.xlu0 %1238 }
 0x1f1   :  { %1418 = vrot.lane.b32.xlu0 %v3759_v14, %s1691_s23  ;;  %v3789_v2 = vadd.f32 %v1239_v57, %v3456_v40  ;;  %v3806_v40 = vadd.f32 %v1273_v41, %v3449_v4 }
 0x1f2   :  { %v1281_v34 = vpop.permute.xlu1 %1280 }
 0x1f4   :  { %1448 = vrot.lane.b32.xlu1 %v3766_v51, %s1691_s23  ;;  %v1243_v37 = vpop.permute.xlu0 %1242 }
 0x1f5   :  { %1422 = vrot.lane.b32.xlu0 %v3769_v44, %s1691_s23  ;;  %v3799_v58 = vadd.f32 %v1243_v37, %v3466_v21  ;;  %v3816_v21 = vadd.f32 %v1277_v0, %v3459_v38  ;;  %v3831_v38 = vadd.f32 %v1281_v34, %v3469_v61  ;;  %v4748_v61 = vld [vmem:[#allocation49_spill] sm:$0xff] }
 0x1f6   :  { %v1285_v42 = vpop.permute.xlu1 %1284 }
 0x1f7   :  { %v3846_v34 = vadd.f32 %v1285_v42, %v4748_v61  ;;  %v4749_v42 = vld [vmem:[#allocation50_spill] sm:$0xff] }
 0x1f8   :  { %1452 = vrot.lane.b32.xlu1 %v3776_v11, %s1691_s23  ;;  %v1247_v31 = vpop.permute.xlu0 %1246 }
 0x1f9   :  { %1426 = vrot.lane.b32.xlu0 %v3779_v54, %s1691_s23  ;;  %v3809_v57 = vadd.f32 %v1247_v31, %v3478_v50 }
 0x1fa   :  { %v1289_v29 = vpop.permute.xlu1 %1288 }
 0x1fc   :  { %1456 = vrot.lane.b32.xlu1 %v3786_v33, %s1691_s23  ;;  %v1251_v47 = vpop.permute.xlu0 %1250 }
 0x1fd   :  { %1430 = vrot.lane.b32.xlu0 %v3789_v2, %s1691_s23  ;;  %v3819_v37 = vadd.f32 %v1251_v47, %v3488_v28  ;;  %v4747_v28 = vld [vmem:[#allocation51_spill] sm:$0xff] }
 0x1fe   :  { %v1293_v52 = vpop.permute.xlu1 %1292 }
 0x200   :  { %1460 = vrot.lane.b32.xlu1 %v3796_v23, %s1691_s23  ;;  %v1255_v15 = vpop.permute.xlu0 %1254 }
 0x201   :  { %1434 = vrot.lane.b32.xlu0 %v3799_v58, %s1691_s23  ;;  %v3834_v0 = vadd.f32 %v1255_v15, %v4747_v28 }
 0x202   :  { %v1297_v19 = vpop.permute.xlu1 %1296 }
 0x204   :  { %1464 = vrot.lane.b32.xlu1 %v3806_v40, %s1691_s23  ;;  %v1259_v35 = vpop.permute.xlu0 %1258 }
 0x205   :  { %1438 = vrot.lane.b32.xlu0 %v3809_v57, %s1691_s23  ;;  %v3849_v15 = vadd.f32 %v1259_v35, %v3508_v32 }
 0x206   :  { %v898_v25 = vpop.permute.xlu1 %897 }
 0x207   :  { %v905_v4 = vadd.f32 %v898_v25, %v3525_v55 }
 0x208   :  { %1468 = vrot.lane.b32.xlu1 %v3816_v21, %s1691_s23  ;;  %v1263_v50 = vpop.permute.xlu0 %1262 }
 0x209   :  { %910 = vst.msk [vmem:[%s4252_s4] sm:$0xff] %vm909_vm5, %v905_v4  ;;  %1442 = vrot.lane.b32.xlu0 %v3819_v37, %s1691_s23  ;;  %v3861_v4 = vadd.f32 %v1289_v29, %v4749_v42  ;;  %v3864_v32 = vadd.f32 %v1263_v50, %v3518_v30  ;;  %v3876_v29 = vadd.f32 %v1293_v52, %v3501_v13  ;;  %v4751_v13 = vld [vmem:[#allocation52_spill] sm:$0xff]  ;;  %v4753_v42 = vld [vmem:[#allocation54_spill] sm:$0xff] }
 0x20a   :  { %v900_v41 = vpop.permute.xlu1 %899  ;;  %v3891_v52 = vadd.f32 %v1297_v19, %v4751_v13 }
 0x20b   :  { %v906_v55 = vadd.f32 %v900_v41, %v3535_v5 }
 0x20c   :  { %1472 = vrot.lane.b32.xlu1 %v3831_v38, %s1691_s23  ;;  %v1267_v31 = vpop.permute.xlu0 %1266 }
 0x20d   :  { %911 = vst.msk [vmem:[%s4252_s4 + $0x8] sm:$0xff] %vm909_vm5, %v906_v55  ;;  %1446 = vrot.lane.b32.xlu0 %v3834_v0, %s1691_s23  ;;  %v3879_v30 = vadd.f32 %v1267_v31, %v3528_v49  ;;  %v4752_v49 = vld [vmem:[#allocation53_spill] sm:$0xff] }
 0x20e   :  { %v904_v47 = vpop.permute.xlu1 %903 }
 0x20f   :  { %v908_v5 = vadd.f32 %v904_v47, %v3545_v60 }
 0x210   :  { %1476 = vrot.lane.b32.xlu1 %v3846_v34, %s1691_s23  ;;  %v1271_v25 = vpop.permute.xlu0 %1270 }
 0x211   :  { %913 = vst.msk [vmem:[%s4252_s4 + $0x18] sm:$0xff] %vm909_vm5, %v908_v5  ;;  %1450 = vrot.lane.b32.xlu0 %v3849_v15, %s1691_s23  ;;  %v3894_v31 = vadd.f32 %v1271_v25, %v4752_v49  ;;  %v4754_v25 = vld [vmem:[#allocation59_spill] sm:$0xff]  ;;  %v4756_v49 = vld [vmem:[#allocation57_spill] sm:$0xff] }
 0x212   :  { %v1365_v41 = vpop.permute.xlu1 %1364 }
 0x213   :  { %v1491_v60 = vadd.f32 %v1365_v41, %v3555_v48  ;;  %v4750_v48 = vld [vmem:[#allocation56_spill] sm:$0xff] }
 0x214   :  { %1480 = vrot.lane.b32.xlu1 %v3861_v4, %s1691_s23  ;;  %v1275_v35 = vpop.permute.xlu0 %1274 }
 0x215   :  { %1555 = vst.msk [vmem:[%s4253_s5 + $0x8] sm:$0xff] %vm909_vm5, %v1491_v60  ;;  %1454 = vrot.lane.b32.xlu0 %v3864_v32, %s1691_s23  ;;  %v3906_v41 = vadd.f32 %v1275_v35, %v4753_v42 }
 0x216   :  { %v1369_v28 = vpop.permute.xlu1 %1368 }
 0x217   :  { %v1493_v50 = vadd.f32 %v1369_v28, %v4750_v48  ;;  %v4755_v48 = vld [vmem:[#allocation55_spill] sm:$0xff] }
 0x218   :  { %1484 = vrot.lane.b32.xlu1 %v3876_v29, %s1691_s23  ;;  %v1279_v55 = vpop.permute.xlu0 %1278 }
 0x219   :  { %1557 = vst.msk [vmem:[%s4253_s5 + $0x18] sm:$0xff] %vm909_vm5, %v1493_v50  ;;  %1458 = vrot.lane.b32.xlu0 %v3879_v30, %s1691_s23  ;;  %v3916_v50 = vadd.f32 %v1279_v55, %v4755_v48  ;;  %v4757_v55 = vld [vmem:[#allocation58_spill] sm:$0xff] }
 0x21a   :  { %v1373_v61 = vpop.permute.xlu1 %1372 }
 0x21b   :  { %v1495_v47 = vadd.f32 %v1373_v61, %v3575_v36 }
 0x21c   :  { %1488 = vrot.lane.b32.xlu1 %v3891_v52, %s1691_s23  ;;  %v1283_v5 = vpop.permute.xlu0 %1282 }
 0x21d   :  { %1559 = vst.msk [vmem:[%s4253_s5 + $0x28] sm:$0xff] %vm909_vm5, %v1495_v47  ;;  %1462 = vrot.lane.b32.xlu0 %v3894_v31, %s1691_s23  ;;  %v3926_v47 = vadd.f32 %v1283_v5, %v4756_v49 }
 0x21e   :  { %v1377_v19 = vpop.permute.xlu1 %1376 }
 0x21f   :  { %v1497_v60 = vadd.f32 %v1377_v19, %v4754_v25 }
 0x220   :  { %v1287_v28 = vpop.permute.xlu0 %1286 }
 0x221   :  { %1561 = vst.msk [vmem:[%s4253_s5 + $0x38] sm:$0xff] %vm909_vm5, %v1497_v60  ;;  %1466 = vrot.lane.b32.xlu0 %v3906_v41, %s1691_s23  ;;  %v3936_v25 = vadd.f32 %v1287_v28, %v4757_v55 }
 0x222   :  { %v1381_v36 = vpop.permute.xlu1 %1380 }
 0x223   :  { %v1499_v13 = vadd.f32 %v1381_v36, %v3595_v6 }
 0x224   :  { %v1291_v61 = vpop.permute.xlu0 %1290 }
 0x225   :  { %1563 = vst.msk [vmem:[%s4253_s5 + $0x48] sm:$0xff] %vm909_vm5, %v1499_v13  ;;  %1470 = vrot.lane.b32.xlu0 %v3916_v50, %s1691_s23  ;;  %v4759_v13 = vld [vmem:[#allocation60_spill] sm:$0xff] }
 0x226   :  { %v1385_v35 = vpop.permute.xlu1 %1384 }
 0x227   :  { %v1501_v19 = vadd.f32 %v1385_v35, %v3605_v27  ;;  %v4758_v27 = vld [vmem:[#allocation62_spill] sm:$0xff]  ;;  %v3947_v35 = vadd.f32 %v1291_v61, %v4759_v13  ;;  %v4760_v61 = vld [vmem:[#allocation63_spill] sm:$0xff] }
 0x228   :  { %v1295_v42 = vpop.permute.xlu0 %1294 }
 0x229   :  { %1565 = vst.msk [vmem:[%s4253_s5 + $0x58] sm:$0xff] %vm909_vm5, %v1501_v19  ;;  %1474 = vrot.lane.b32.xlu0 %v3926_v47, %s1691_s23 }
 0x22a   :  { %v1389_v6 = vpop.permute.xlu1 %1388 }
 0x22b   :  { %v1503_v60 = vadd.f32 %v1389_v6, %v3616_v56  ;;  %v4761_v6 = vld [vmem:[#allocation61_spill] sm:$0xff] }
 0x22c   :  { %v902_v36 = vpop.permute.xlu0 %901  ;;  %v3965_v55 = vadd.f32 %v1295_v42, %v4761_v6 }
 0x22d   :  { %1567 = vst.msk [vmem:[%s4253_s5 + $0x68] sm:$0xff] %vm909_vm5, %v1503_v60  ;;  %v907_v5 = vadd.f32 %v902_v36, %v4758_v27  ;;  %1478 = vrot.lane.b32.xlu0 %v3936_v25, %s1691_s23 }
 0x22e   :  { %v1393_v48 = vpop.permute.xlu1 %1392 }
 0x22f   :  { %912 = vst.msk [vmem:[%s4252_s4 + $0x10] sm:$0xff] %vm909_vm5, %v907_v5  ;;  %v1505_v56 = vadd.f32 %v1393_v48, %v3626_v26  ;;  %v4762_v5 = vld [vmem:[#allocation64_spill] sm:$0xff] }
 0x230   :  { %v1363_v28 = vpop.permute.xlu0 %1362 }
 0x231   :  { %1569 = vst.msk [vmem:[%s4253_s5 + $0x78] sm:$0xff] %vm909_vm5, %v1505_v56  ;;  %v1490_v49 = vadd.f32 %v1363_v28, %v4760_v61  ;;  %1482 = vrot.lane.b32.xlu0 %v3947_v35, %s1691_s23 }
 0x232   :  { %v1397_v19 = vpop.permute.xlu1 %1396 }
 0x233   :  { %1554 = vst.msk [vmem:[%s4253_s5] sm:$0xff] %vm909_vm5, %v1490_v49  ;;  %v1507_v26 = vadd.f32 %v1397_v19, %v3636_v22 }
 0x234   :  { %v1367_v60 = vpop.permute.xlu0 %1366 }
 0x235   :  { %1571 = vst.msk [vmem:[%s4253_s5 + $0x88] sm:$0xff] %vm909_vm5, %v1507_v26  ;;  %v1492_v36 = vadd.f32 %v1367_v60, %v3629_v3  ;;  %1486 = vrot.lane.b32.xlu0 %v3965_v55, %s1691_s23 }
 0x236   :  { %v1401_v42 = vpop.permute.xlu1 %1400 }
 0x237   :  { %1556 = vst.msk [vmem:[%s4253_s5 + $0x10] sm:$0xff] %vm909_vm5, %v1492_v36  ;;  %v1509_v27 = vadd.f32 %v1401_v42, %v3646_v8 }
 0x238   :  { %v1371_v22 = vpop.permute.xlu0 %1370 }
 0x239   :  { %1573 = vst.msk [vmem:[%s4253_s5 + $0x98] sm:$0xff] %vm909_vm5, %v1509_v27  ;;  %v1494_v48 = vadd.f32 %v1371_v22, %v4762_v5 }
 0x23a   :  { %v1405_v3 = vpop.permute.xlu1 %1404 }
 0x23b   :  { %1558 = vst.msk [vmem:[%s4253_s5 + $0x20] sm:$0xff] %vm909_vm5, %v1494_v48  ;;  %v1511_v13 = vadd.f32 %v1405_v3, %v3656_v43  ;;  %v4763_v43 = vld [vmem:[#allocation65_spill] sm:$0xff] }
 0x23c   :  { %v1375_v56 = vpop.permute.xlu0 %1374 }
 0x23d   :  { %1575 = vst.msk [vmem:[%s4253_s5 + $0xa8] sm:$0xff] %vm909_vm5, %v1511_v13  ;;  %v1496_v8 = vadd.f32 %v1375_v56, %v3649_v59 }
 0x23e   :  { %v1409_v28 = vpop.permute.xlu1 %1408 }
 0x23f   :  { %1560 = vst.msk [vmem:[%s4253_s5 + $0x30] sm:$0xff] %vm909_vm5, %v1496_v8  ;;  %v1513_v61 = vadd.f32 %v1409_v28, %v3666_v12  ;;  %v4764_v12 = vld [vmem:[#allocation66_spill] sm:$0xff] }
 0x240   :  { %v1379_v49 = vpop.permute.xlu0 %1378 }
 0x241   :  { %1577 = vst.msk [vmem:[%s4253_s5 + $0xb8] sm:$0xff] %vm909_vm5, %v1513_v61  ;;  %v1498_v19 = vadd.f32 %v1379_v49, %v4763_v43 }
 0x242   :  { %v1413_v6 = vpop.permute.xlu1 %1412 }
 0x243   :  { %1562 = vst.msk [vmem:[%s4253_s5 + $0x40] sm:$0xff] %vm909_vm5, %v1498_v19  ;;  %v1515_v59 = vadd.f32 %v1413_v6, %v3676_v53  ;;  %v4765_v53 = vld [vmem:[#allocation67_spill] sm:$0xff] }
 0x244   :  { %v1383_v26 = vpop.permute.xlu0 %1382 }
 0x245   :  { %1579 = vst.msk [vmem:[%s4253_s5 + $0xc8] sm:$0xff] %vm909_vm5, %v1515_v59  ;;  %v1500_v60 = vadd.f32 %v1383_v26, %v4764_v12 }
 0x246   :  { %v1417_v36 = vpop.permute.xlu1 %1416 }
 0x247   :  { %1564 = vst.msk [vmem:[%s4253_s5 + $0x50] sm:$0xff] %vm909_vm5, %v1500_v60  ;;  %v1517_v42 = vadd.f32 %v1417_v36, %v3686_v24 }
 0x248   :  { %v1387_v27 = vpop.permute.xlu0 %1386 }
 0x249   :  { %1581 = vst.msk [vmem:[%s4253_s5 + $0xd8] sm:$0xff] %vm909_vm5, %v1517_v42  ;;  %v1502_v22 = vadd.f32 %v1387_v27, %v4765_v53 }
 0x24a   :  { %v1421_v5 = vpop.permute.xlu1 %1420 }
 0x24b   :  { %1566 = vst.msk [vmem:[%s4253_s5 + $0x60] sm:$0xff] %vm909_vm5, %v1502_v22  ;;  %v1519_v48 = vadd.f32 %v1421_v5, %v3696_v62  ;;  %v4766_v62 = vld [vmem:[#allocation68_spill] sm:$0xff] }
 0x24c   :  { %v1391_v3 = vpop.permute.xlu0 %1390 }
 0x24d   :  { %1583 = vst.msk [vmem:[%s4253_s5 + $0xe8] sm:$0xff] %vm909_vm5, %v1519_v48  ;;  %v1504_v24 = vadd.f32 %v1391_v3, %v3689_v9 }
 0x24e   :  { %v1425_v13 = vpop.permute.xlu1 %1424 }
 0x24f   :  { %1568 = vst.msk [vmem:[%s4253_s5 + $0x70] sm:$0xff] %vm909_vm5, %v1504_v24  ;;  %v1521_v56 = vadd.f32 %v1425_v13, %v3706_v63 }
 0x250   :  { %v1395_v8 = vpop.permute.xlu0 %1394 }
 0x251   :  { %1585 = vst.msk [vmem:[%s4253_s5 + $0xf8] sm:$0xff] %vm909_vm5, %v1521_v56  ;;  %v1506_v28 = vadd.f32 %v1395_v8, %v4766_v62 }
 0x252   :  { %v1429_v61 = vpop.permute.xlu1 %1428 }
 0x253   :  { %1570 = vst.msk [vmem:[%s4253_s5 + $0x80] sm:$0xff] %vm909_vm5, %v1506_v28  ;;  %v1523_v9 = vadd.f32 %v1429_v61, %v3716_v18 }
 0x254   :  { %v1399_v49 = vpop.permute.xlu0 %1398 }
 0x255   :  { %1587 = vst.msk [vmem:[%s4253_s5 + $0x108] sm:$0xff] %vm909_vm5, %v1523_v9  ;;  %v1508_v63 = vadd.f32 %v1399_v49, %v3709_v20 }
 0x256   :  { %v1433_v43 = vpop.permute.xlu1 %1432 }
 0x257   :  { %1572 = vst.msk [vmem:[%s4253_s5 + $0x90] sm:$0xff] %vm909_vm5, %v1508_v63  ;;  %v1525_v19 = vadd.f32 %v1433_v43, %v3726_v46 }
 0x258   :  { %v1403_v6 = vpop.permute.xlu0 %1402 }
 0x259   :  { %1589 = vst.msk [vmem:[%s4253_s5 + $0x118] sm:$0xff] %vm909_vm5, %v1525_v19  ;;  %v1510_v18 = vadd.f32 %v1403_v6, %v3719_v39 }
 0x25a   :  { %v1437_v59 = vpop.permute.xlu1 %1436 }
 0x25b   :  { %1574 = vst.msk [vmem:[%s4253_s5 + $0xa0] sm:$0xff] %vm909_vm5, %v1510_v18  ;;  %v1527_v20 = vadd.f32 %v1437_v59, %v3736_v1 }
 0x25c   :  { %v1407_v26 = vpop.permute.xlu0 %1406 }
 0x25d   :  { %1591 = vst.msk [vmem:[%s4253_s5 + $0x128] sm:$0xff] %vm909_vm5, %v1527_v20  ;;  %v1512_v46 = vadd.f32 %v1407_v26, %v3729_v16 }
 0x25e   :  { %v1441_v12 = vpop.permute.xlu1 %1440 }
 0x25f   :  { %1576 = vst.msk [vmem:[%s4253_s5 + $0xb0] sm:$0xff] %vm909_vm5, %v1512_v46  ;;  %v1529_v39 = vadd.f32 %v1441_v12, %v3746_v10 }
 0x260   :  { %v1411_v60 = vpop.permute.xlu0 %1410 }
 0x261   :  { %1593 = vst.msk [vmem:[%s4253_s5 + $0x138] sm:$0xff] %vm909_vm5, %v1529_v39  ;;  %v1514_v1 = vadd.f32 %v1411_v60, %v3739_v17 }
 0x262   :  { %v1445_v36 = vpop.permute.xlu1 %1444 }
 0x263   :  { %1578 = vst.msk [vmem:[%s4253_s5 + $0xc0] sm:$0xff] %vm909_vm5, %v1514_v1  ;;  %v1531_v16 = vadd.f32 %v1445_v36, %v3756_v7 }
 0x264   :  { %v1415_v42 = vpop.permute.xlu0 %1414 }
 0x265   :  { %1595 = vst.msk [vmem:[%s4253_s5 + $0x148] sm:$0xff] %vm909_vm5, %v1531_v16  ;;  %v1516_v10 = vadd.f32 %v1415_v42, %v3749_v45 }
 0x266   :  { %v1449_v27 = vpop.permute.xlu1 %1448 }
 0x267   :  { %1580 = vst.msk [vmem:[%s4253_s5 + $0xd0] sm:$0xff] %vm909_vm5, %v1516_v10  ;;  %v1533_v17 = vadd.f32 %v1449_v27, %v3766_v51 }
 0x268   :  { %v1419_v53 = vpop.permute.xlu0 %1418 }
 0x269   :  { %1597 = vst.msk [vmem:[%s4253_s5 + $0x158] sm:$0xff] %vm909_vm5, %v1533_v17  ;;  %v1518_v7 = vadd.f32 %v1419_v53, %v3759_v14 }
 0x26a   :  { %v1453_v22 = vpop.permute.xlu1 %1452 }
 0x26b   :  { %1582 = vst.msk [vmem:[%s4253_s5 + $0xe0] sm:$0xff] %vm909_vm5, %v1518_v7  ;;  %v1535_v45 = vadd.f32 %v1453_v22, %v3776_v11 }
 0x26c   :  { %v1423_v5 = vpop.permute.xlu0 %1422 }
 0x26d   :  { %1599 = vst.msk [vmem:[%s4253_s5 + $0x168] sm:$0xff] %vm909_vm5, %v1535_v45  ;;  %v1520_v51 = vadd.f32 %v1423_v5, %v3769_v44 }
 0x26e   :  { %v1457_v48 = vpop.permute.xlu1 %1456 }
 0x26f   :  { %1584 = vst.msk [vmem:[%s4253_s5 + $0xf0] sm:$0xff] %vm909_vm5, %v1520_v51  ;;  %v1537_v14 = vadd.f32 %v1457_v48, %v3786_v33 }
 0x270   :  { %v1427_v3 = vpop.permute.xlu0 %1426 }
 0x271   :  { %1601 = vst.msk [vmem:[%s4253_s5 + $0x178] sm:$0xff] %vm909_vm5, %v1537_v14  ;;  %v1522_v11 = vadd.f32 %v1427_v3, %v3779_v54 }
 0x272   :  { %v1461_v24 = vpop.permute.xlu1 %1460 }
 0x273   :  { %1586 = vst.msk [vmem:[%s4253_s5 + $0x100] sm:$0xff] %vm909_vm5, %v1522_v11  ;;  %v1539_v44 = vadd.f32 %v1461_v24, %v3796_v23 }
 0x274   :  { %v1431_v13 = vpop.permute.xlu0 %1430 }
 0x275   :  { %1603 = vst.msk [vmem:[%s4253_s5 + $0x188] sm:$0xff] %vm909_vm5, %v1539_v44  ;;  %v1524_v33 = vadd.f32 %v1431_v13, %v3789_v2 }
 0x276   :  { %v1465_v56 = vpop.permute.xlu1 %1464 }
 0x277   :  { %1588 = vst.msk [vmem:[%s4253_s5 + $0x110] sm:$0xff] %vm909_vm5, %v1524_v33  ;;  %v1541_v54 = vadd.f32 %v1465_v56, %v3806_v40 }
 0x278   :  { %v1435_v8 = vpop.permute.xlu0 %1434 }
 0x279   :  { %1605 = vst.msk [vmem:[%s4253_s5 + $0x198] sm:$0xff] %vm909_vm5, %v1541_v54  ;;  %v1526_v23 = vadd.f32 %v1435_v8, %v3799_v58 }
 0x27a   :  { %v1469_v62 = vpop.permute.xlu1 %1468 }
 0x27b   :  { %1590 = vst.msk [vmem:[%s4253_s5 + $0x120] sm:$0xff] %vm909_vm5, %v1526_v23  ;;  %v1543_v2 = vadd.f32 %v1469_v62, %v3816_v21 }
 0x27c   :  { %v1439_v28 = vpop.permute.xlu0 %1438 }
 0x27d   :  { %1607 = vst.msk [vmem:[%s4253_s5 + $0x1a8] sm:$0xff] %vm909_vm5, %v1543_v2  ;;  %v1528_v40 = vadd.f32 %v1439_v28, %v3809_v57 }
 0x27e   :  { %v1473_v61 = vpop.permute.xlu1 %1472 }
 0x27f   :  { %1592 = vst.msk [vmem:[%s4253_s5 + $0x130] sm:$0xff] %vm909_vm5, %v1528_v40  ;;  %v1545_v58 = vadd.f32 %v1473_v61, %v3831_v38 }
 0x280   :  { %v1443_v9 = vpop.permute.xlu0 %1442 }
 0x281   :  { %1609 = vst.msk [vmem:[%s4253_s5 + $0x1b8] sm:$0xff] %vm909_vm5, %v1545_v58  ;;  %v1530_v21 = vadd.f32 %v1443_v9, %v3819_v37 }
 0x282   :  { %v1477_v49 = vpop.permute.xlu1 %1476 }
 0x283   :  { %1594 = vst.msk [vmem:[%s4253_s5 + $0x140] sm:$0xff] %vm909_vm5, %v1530_v21  ;;  %v1547_v57 = vadd.f32 %v1477_v49, %v3846_v34 }
 0x284   :  { %v1447_v63 = vpop.permute.xlu0 %1446 }
 0x285   :  { %1611 = vst.msk [vmem:[%s4253_s5 + $0x1c8] sm:$0xff] %vm909_vm5, %v1547_v57  ;;  %v1532_v38 = vadd.f32 %v1447_v63, %v3834_v0 }
 0x286   :  { %v1481_v43 = vpop.permute.xlu1 %1480 }
 0x287   :  { %1596 = vst.msk [vmem:[%s4253_s5 + $0x150] sm:$0xff] %vm909_vm5, %v1532_v38  ;;  %v1549_v37 = vadd.f32 %v1481_v43, %v3861_v4 }
 0x288   :  { %v1451_v19 = vpop.permute.xlu0 %1450 }
 0x289   :  { %1613 = vst.msk [vmem:[%s4253_s5 + $0x1d8] sm:$0xff] %vm909_vm5, %v1549_v37  ;;  %v1534_v34 = vadd.f32 %v1451_v19, %v3849_v15 }
 0x28a   :  { %v1485_v6 = vpop.permute.xlu1 %1484 }
 0x28b   :  { %1598 = vst.msk [vmem:[%s4253_s5 + $0x160] sm:$0xff] %vm909_vm5, %v1534_v34  ;;  %v1551_v0 = vadd.f32 %v1485_v6, %v3876_v29 }
 0x28c   :  { %v1455_v18 = vpop.permute.xlu0 %1454 }
 0x28d   :  { %1615 = vst.msk [vmem:[%s4253_s5 + $0x1e8] sm:$0xff] %vm909_vm5, %v1551_v0  ;;  %v1536_v4 = vadd.f32 %v1455_v18, %v3864_v32 }
 0x28e   :  { %v1489_v59 = vpop.permute.xlu1 %1488 }
 0x28f   :  { %1600 = vst.msk [vmem:[%s4253_s5 + $0x170] sm:$0xff] %vm909_vm5, %v1536_v4  ;;  %v1553_v15 = vadd.f32 %v1489_v59, %v3891_v52 }
 0x290   :  { %v1459_v20 = vpop.permute.xlu0 %1458 }
 0x291   :  { %1617 = vst.msk [vmem:[%s4253_s5 + $0x1f8] sm:$0xff] %vm909_vm5, %v1553_v15  ;;  %v1538_v29 = vadd.f32 %v1459_v20, %v3879_v30 }
 0x293   :  { %1602 = vst.msk [vmem:[%s4253_s5 + $0x180] sm:$0xff] %vm909_vm5, %v1538_v29 }
 0x294   :  { %v1463_v32 = vpop.permute.xlu0 %1462 }
 0x295   :  { %v1540_v26 = vadd.f32 %v1463_v32, %v3894_v31 }
 0x297   :  { %1604 = vst.msk [vmem:[%s4253_s5 + $0x190] sm:$0xff] %vm909_vm5, %v1540_v26 }
 0x298   :  { %v1467_v52 = vpop.permute.xlu0 %1466 }
 0x299   :  { %v1542_v46 = vadd.f32 %v1467_v52, %v3906_v41 }
 0x29b   :  { %1606 = vst.msk [vmem:[%s4253_s5 + $0x1a0] sm:$0xff] %vm909_vm5, %v1542_v46 }
 0x29c   :  { %v1471_v30 = vpop.permute.xlu0 %1470 }
 0x29d   :  { %v1544_v12 = vadd.f32 %v1471_v30, %v3916_v50 }
 0x29f   :  { %1608 = vst.msk [vmem:[%s4253_s5 + $0x1b0] sm:$0xff] %vm909_vm5, %v1544_v12 }
 0x2a0   :  { %v1475_v31 = vpop.permute.xlu0 %1474 }
 0x2a1   :  { %v1546_v39 = vadd.f32 %v1475_v31, %v3926_v47 }
 0x2a3   :  { %1610 = vst.msk [vmem:[%s4253_s5 + $0x1c0] sm:$0xff] %vm909_vm5, %v1546_v39 }
 0x2a4   :  { %v1479_v41 = vpop.permute.xlu0 %1478 }
 0x2a5   :  { %v1548_v60 = vadd.f32 %v1479_v41, %v3936_v25 }
 0x2a7   :  { %1612 = vst.msk [vmem:[%s4253_s5 + $0x1d0] sm:$0xff] %vm909_vm5, %v1548_v60 }
 0x2a8   :  { %v1483_v50 = vpop.permute.xlu0 %1482 }
 0x2a9   :  { %v1550_v1 = vadd.f32 %v1483_v50, %v3947_v35 }
 0x2ab   :  { %1614 = vst.msk [vmem:[%s4253_s5 + $0x1e0] sm:$0xff] %vm909_vm5, %v1550_v1 }
 0x2ac   :  { %v1487_v47 = vpop.permute.xlu0 %1486 }
 0x2ad   :  { %v1552_v36 = vadd.f32 %v1487_v47, %v3965_v55 }
 0x2af   :  { %1616 = vst.msk [vmem:[%s4253_s5 + $0x1f0] sm:$0xff] %vm909_vm5, %v1552_v36 }
 0x2b0   :  { %1685 = dma.done.wait [#allocation3], 16  }
 0x2b1   :  { %1686 = vsyncadd [#allocation3], 4294967280 }
 0x2b2   :  { %1645 = sfence }
 0x2b3   :  { %1646 = vsyncpa [#allocation3], 1 }

</bundles_post_ra>
